<compile_context>
chip_gen: v7x
topology: tpu7x:2x2x1
jax: 0.10.0
libtpu: 0.0.40
codegen_flags: <defaults>
</compile_context>

<pallas_src>
import jax
import jax.numpy as jnp
from jax import lax
from jax.experimental import pallas as pl
from jax.experimental.pallas import tpu as pltpu

# ----------------------------- config (small, synthetic) -----------------------------
VOCAB_SIZE = 100
HIDDEN_SIZE = 32
NUM_LABELS = 3
IMG_FEAT_DIM = 20
T_TEXT = 8
T_IMG = 4
BATCH = 2

_VMEM = pl.BlockSpec(memory_space=pltpu.MemorySpace.VMEM)


# ----------------------------- fused Pallas kernel -----------------------------
def _fused_kernel(ids_ref, img_ref, emb_gates_ref, wimg_gates_ref, bimg_gates_ref,
                  whh_ref, wcls_ref, bcls_ref, labels_ref,
                  logits_ref, loss_ref):
    """Embedding gather + image projection + LSTM + classifier + CE loss, fully fused.

    ids_ref : (T_text*B, 1) int32, TIME-MAJOR flattened token ids
    img_ref : (T_img*B, D)  f32,   TIME-MAJOR flattened image features
    emb_gates_ref / wimg_gates_ref already have W_ih (and b_lstm) folded in (bf16).
    """
    # All sizes derived from ref shapes (no hard-coded module globals).
    B = labels_ref.shape[0]
    H = whh_ref.shape[0]
    C = wcls_ref.shape[1]
    Vp = emb_gates_ref.shape[0]                     # vocab padded to 128
    T_text = ids_ref.shape[0] // B
    T_img = img_ref.shape[0] // B

    # --- text gate pre-activations: one-hot gather against the PRE-FUSED (V,4H) table ---
    ids = ids_ref[...]                                                    # (T_text*B, 1)
    vocab_iota = lax.broadcasted_iota(jnp.int32, (T_text * B, Vp), 1)
    onehot = (vocab_iota == ids).astype(jnp.float32).astype(jnp.bfloat16)  # exact 0/1
    gates_text = jnp.dot(onehot, emb_gates_ref[...],
                         preferred_element_type=jnp.float32)              # (T_text*B, 4H)

    # --- image gate pre-activations (W_img @ W_ih folded offline) ---
    gates_img = (jnp.dot(img_ref[...].astype(jnp.bfloat16), wimg_gates_ref[...],
                         preferred_element_type=jnp.float32)
                 + bimg_gates_ref[...])                                   # (T_img*B, 4H)

    # --- LSTM recurrence: only h @ W_hh remains on the serial path ---
    w_hh = whh_ref[...]                                                   # bf16, loaded once
    h = jnp.zeros((B, H), jnp.float32)
    c = jnp.zeros((B, H), jnp.float32)
    for t in range(T_text + T_img):                                       # fully unrolled (T=12)
        if t < T_text:                                                    # trace-time branch
            gx = gates_text[t * B:(t + 1) * B, :]
        else:
            tt = t - T_text
            gx = gates_img[tt * B:(tt + 1) * B, :]
        pre = gx + jnp.dot(h.astype(jnp.bfloat16), w_hh,
                           preferred_element_type=jnp.float32)            # (B, 4H) f32
        sg = jax.nn.sigmoid(pre)                                          # full-vreg EUP
        th = jnp.tanh(pre)                                                # full-vreg EUP
        # PyTorch gate order: i, f, g, o
        i_g = sg[:, 0:H]
        f_g = sg[:, H:2 * H]
        g_g = th[:, 2 * H:3 * H]
        o_g = sg[:, 3 * H:4 * H]
        c = f_g * c + i_g * g_g                                           # f32 VPU
        h = o_g * jnp.tanh(c)

    # --- classifier ---
    logits = (jnp.dot(h.astype(jnp.bfloat16), wcls_ref[...],
                      preferred_element_type=jnp.float32)
              + bcls_ref[...])                                            # (B, C) f32
    logits_ref[...] = logits

    # --- mean cross-entropy, fully vectorized label pick ---
    m = jnp.max(logits, axis=-1, keepdims=True)
    shifted = logits - m
    lse = jnp.log(jnp.sum(jnp.exp(shifted), axis=-1, keepdims=True))
    logp = shifted - lse                                                  # (B, C)

    lane = lax.broadcasted_iota(jnp.int32, (B, C), 1)
    picked = jnp.where(lane == labels_ref[...], logp, 0.0)                # (B, C)
    per_row = jnp.sum(picked, axis=1, keepdims=True)                      # (B, 1)
    loss_ref[...] = -jnp.sum(per_row, axis=0, keepdims=True) * (1.0 / B)  # (1, 1)


# ----------------------------- offline weight fusion -----------------------------
def fuse_params(params):
    """Fold W_ih / b_lstm into the embedding table and the image projection (one-time,
    outside the kernel); pad vocab to a full 128 lane/K tile; cast MXU operands to bf16."""
    V, H = params["embedding"].shape
    Vp = ((V + 127) // 128) * 128
    emb_pad = jnp.zeros((Vp, H), jnp.float32).at[:V, :].set(params["embedding"])
    emb_gates = emb_pad @ params["w_ih"] + params["b_lstm"]               # (Vp, 4H)
    w_img_gates = params["w_img"] @ params["w_ih"]                        # (D, 4H)
    b_img_gates = params["b_img"] @ params["w_ih"] + params["b_lstm"]     # (1, 4H)
    return dict(
        emb_gates=emb_gates.astype(jnp.bfloat16),
        w_img_gates=w_img_gates.astype(jnp.bfloat16),
        b_img_gates=b_img_gates.astype(jnp.float32),
        w_hh=params["w_hh"].astype(jnp.bfloat16),
        w_cls=params["w_cls"].astype(jnp.bfloat16),
        b_cls=params["b_cls"].astype(jnp.float32),
    )


# ----------------------------- wrapper -----------------------------
def lstm_finetuning_forward(fused, input_ids, img_feats, labels):
    """Mirrors LSTMFineTuning.forward: (_, pooled) = lstm(ids, img); logits = classifier(pooled);
    loss = CrossEntropyLoss()(logits, labels); returns (loss, logits)."""
    B, T_text = input_ids.shape
    _, T_img, D = img_feats.shape
    C = fused["w_cls"].shape[1]

    # time-major flattening (row index = t*B + b); tiny, one-time layout plumbing
    ids_tm = jnp.transpose(input_ids, (1, 0)).reshape(T_text * B, 1).astype(jnp.int32)
    img_tm = jnp.transpose(img_feats, (1, 0, 2)).reshape(T_img * B, D).astype(jnp.float32)

    logits, loss = pl.pallas_call(
        _fused_kernel,
        out_shape=(jax.ShapeDtypeStruct((B, C), jnp.float32),
                   jax.ShapeDtypeStruct((1, 1), jnp.float32)),
        in_specs=[_VMEM] * 9,
        out_specs=(_VMEM, _VMEM),
    )(ids_tm, img_tm,
      fused["emb_gates"], fused["w_img_gates"], fused["b_img_gates"],
      fused["w_hh"], fused["w_cls"], fused["b_cls"],
      labels.astype(jnp.int32).reshape(B, 1))
    return loss[0, 0], logits


# ----------------------------- deterministic params -----------------------------
def init_params(key):
    ks = jax.random.split(key, 6)

    def nrm(k, shape, scale=0.05):
        return (scale * jax.random.normal(k, shape)).astype(jnp.float32)

    return dict(
        embedding=nrm(ks[0], (VOCAB_SIZE, HIDDEN_SIZE)),
        w_img=nrm(ks[1], (IMG_FEAT_DIM, HIDDEN_SIZE)),
        b_img=jnp.zeros((1, HIDDEN_SIZE), jnp.float32),
        w_ih=nrm(ks[2], (HIDDEN_SIZE, 4 * HIDDEN_SIZE)),   # stored as (Hin, 4H) = W_ih^T
        w_hh=nrm(ks[3], (HIDDEN_SIZE, 4 * HIDDEN_SIZE)),   # stored as (H, 4H)  = W_hh^T
        b_lstm=nrm(ks[4], (1, 4 * HIDDEN_SIZE)),           # b_ih + b_hh combined
        w_cls=nrm(ks[5], (HIDDEN_SIZE, NUM_LABELS)),
        b_cls=jnp.zeros((1, NUM_LABELS), jnp.float32),
    )


# ----------------------------- pure-JAX reference (f32, un-fused params) -----------------------------
def reference_forward(params, input_ids, img_feats, labels):
    emb = jnp.take(params["embedding"], input_ids, axis=0)
    img_proj = img_feats @ params["w_img"] + params["b_img"]
    seq = jnp.concatenate([emb, img_proj], axis=1)
    B, _, H = seq.shape

    def step(carry, x_t):
        h, c = carry
        gates = x_t @ params["w_ih"] + h @ params["w_hh"] + params["b_lstm"]
        i = jax.nn.sigmoid(gates[:, :H])
        f = jax.nn.sigmoid(gates[:, H:2 * H])
        g = jnp.tanh(gates[:, 2 * H:3 * H])
        o = jax.nn.sigmoid(gates[:, 3 * H:4 * H])
        c = f * c + i * g
        h = o * jnp.tanh(c)
        return (h, c), None

    (h, _), _ = lax.scan(step, (jnp.zeros((B, H)), jnp.zeros((B, H))),
                         jnp.transpose(seq, (1, 0, 2)))
    logits = h @ params["w_cls"] + params["b_cls"]
    logp = jax.nn.log_softmax(logits, axis=-1)
    loss = -jnp.mean(jnp.take_along_axis(logp, labels[:, None], axis=1))
    return loss, logits


# ----------------------------- main -----------------------------
if __name__ == "__main__":
    key = jax.random.PRNGKey(0)
    kp, ki, kf, kl = jax.random.split(key, 4)

    params = init_params(kp)
    fused = fuse_params(params)
    input_ids = jax.random.randint(ki, (BATCH, T_TEXT), 0, VOCAB_SIZE, dtype=jnp.int32)
    img_feats = jax.random.normal(kf, (BATCH, T_IMG, IMG_FEAT_DIM), dtype=jnp.float32)
    labels = jax.random.randint(kl, (BATCH,), 0, NUM_LABELS, dtype=jnp.int32)

    loss, logits = lstm_finetuning_forward(fused, input_ids, img_feats, labels)
    loss, logits = jax.block_until_ready((loss, logits))

    ref_loss, ref_logits = reference_forward(params, input_ids, img_feats, labels)
    # Tolerance loosened vs pure-f32: MXU operands are bf16 (f32 accumulation), small drift
    # accumulates over the 12 serial recurrence steps.
    assert jnp.allclose(logits, ref_logits, atol=1e-2, rtol=1e-2), "logits mismatch"
    assert jnp.allclose(loss, ref_loss, atol=1e-2, rtol=1e-2), "loss mismatch"

    print("KERNEL_OK")
</pallas_src>

<mosaic_0001>
module attributes {stable_mosaic.version = 11 : i64} {
  func.func @_fused_kernel(%arg0: memref<16x1xi32, #tpu.memory_space<vmem>>, %arg1: memref<8x20xf32, #tpu.memory_space<vmem>>, %arg2: memref<128x128xbf16, #tpu.memory_space<vmem>>, %arg3: memref<20x128xbf16, #tpu.memory_space<vmem>>, %arg4: memref<1x128xf32, #tpu.memory_space<vmem>>, %arg5: memref<32x128xbf16, #tpu.memory_space<vmem>>, %arg6: memref<32x3xbf16, #tpu.memory_space<vmem>>, %arg7: memref<1x3xf32, #tpu.memory_space<vmem>>, %arg8: memref<2x1xi32, #tpu.memory_space<vmem>>, %arg9: memref<2x3xf32, #tpu.memory_space<vmem>>, %arg10: memref<1x1xf32, #tpu.memory_space<vmem>>) attributes {dimension_semantics = [], scalar_prefetch = 0 : i64, scratch_operands = 0 : i64, tpu.core_type = #tpu.core_type<tc>} {
    %c0 = arith.constant 0 : index
    %c0_0 = arith.constant 0 : index
    %0 = vector.load %arg0[%c0, %c0_0] : memref<16x1xi32, #tpu.memory_space<vmem>>, vector<16x1xi32>
    %1 = tpu.iota {dimensions = array<i32: 1>} : vector<16x128xi32>
    %2 = vector.broadcast %0 : vector<16x1xi32> to vector<16x128xi32>
    %3 = arith.cmpi eq, %1, %2 : vector<16x128xi32>
    %4 = arith.extui %3 : vector<16x128xi1> to vector<16x128xi32>
    %5 = arith.sitofp %4 : vector<16x128xi32> to vector<16x128xf32>
    %6 = arith.truncf %5 : vector<16x128xf32> to vector<16x128xbf16>
    %c0_1 = arith.constant 0 : index
    %c0_2 = arith.constant 0 : index
    %7 = vector.load %arg2[%c0_1, %c0_2] : memref<128x128xbf16, #tpu.memory_space<vmem>>, vector<128x128xbf16>
    %cst = arith.constant dense<0.000000e+00> : vector<16x128xf32>
    %8 = tpu.matmul %6, %7, %cst {dimension_numbers = #tpu.dot_dimension_numbers<[1], [0], [0], [1], [0, 0, 1, 1], [], []>} : vector<16x128xbf16>, vector<128x128xbf16>, vector<16x128xf32> -> vector<16x128xf32>
    %c0_3 = arith.constant 0 : index
    %c0_4 = arith.constant 0 : index
    %9 = vector.load %arg1[%c0_3, %c0_4] : memref<8x20xf32, #tpu.memory_space<vmem>>, vector<8x20xf32>
    %10 = arith.truncf %9 : vector<8x20xf32> to vector<8x20xbf16>
    %c0_5 = arith.constant 0 : index
    %c0_6 = arith.constant 0 : index
    %11 = vector.load %arg3[%c0_5, %c0_6] : memref<20x128xbf16, #tpu.memory_space<vmem>>, vector<20x128xbf16>
    %cst_7 = arith.constant dense<0.000000e+00> : vector<8x128xf32>
    %12 = tpu.matmul %10, %11, %cst_7 {dimension_numbers = #tpu.dot_dimension_numbers<[1], [0], [0], [1], [0, 0, 1, 1], [], []>} : vector<8x20xbf16>, vector<20x128xbf16>, vector<8x128xf32> -> vector<8x128xf32>
    %c0_8 = arith.constant 0 : index
    %c0_9 = arith.constant 0 : index
    %13 = vector.load %arg4[%c0_8, %c0_9] : memref<1x128xf32, #tpu.memory_space<vmem>>, vector<1x128xf32>
    %14 = vector.broadcast %13 : vector<1x128xf32> to vector<8x128xf32>
    %15 = arith.addf %12, %14 : vector<8x128xf32>
    %c0_10 = arith.constant 0 : index
    %c0_11 = arith.constant 0 : index
    %16 = vector.load %arg5[%c0_10, %c0_11] : memref<32x128xbf16, #tpu.memory_space<vmem>>, vector<32x128xbf16>
    %cst_12 = arith.constant 0.000000e+00 : f32
    %17 = vector.broadcast %cst_12 : f32 to vector<2x32xf32>
    %cst_13 = arith.constant 0.000000e+00 : f32
    %18 = vector.broadcast %cst_13 : f32 to vector<2x32xf32>
    %19 = vector.extract_strided_slice %8 {offsets = [0, 0], sizes = [2, 128], strides = [1, 1]} : vector<16x128xf32> to vector<2x128xf32>
    %20 = arith.truncf %17 : vector<2x32xf32> to vector<2x32xbf16>
    %cst_14 = arith.constant dense<0.000000e+00> : vector<2x128xf32>
    %21 = tpu.matmul %20, %16, %cst_14 {dimension_numbers = #tpu.dot_dimension_numbers<[1], [0], [0], [1], [0, 0, 1, 1], [], []>} : vector<2x32xbf16>, vector<32x128xbf16>, vector<2x128xf32> -> vector<2x128xf32>
    %22 = arith.addf %19, %21 : vector<2x128xf32>
    %23 = arith.negf %22 : vector<2x128xf32>
    %24 = math.exp %23 : vector<2x128xf32>
    %cst_15 = arith.constant 1.000000e+00 : f32
    %25 = vector.broadcast %cst_15 : f32 to vector<2x128xf32>
    %26 = arith.addf %25, %24 : vector<2x128xf32>
    %27 = arith.divf %25, %26 : vector<2x128xf32>
    %28 = math.tanh %22 : vector<2x128xf32>
    %29 = vector.extract_strided_slice %27 {offsets = [0, 0], sizes = [2, 32], strides = [1, 1]} : vector<2x128xf32> to vector<2x32xf32>
    %30 = vector.extract_strided_slice %27 {offsets = [0, 32], sizes = [2, 32], strides = [1, 1]} : vector<2x128xf32> to vector<2x32xf32>
    %31 = vector.extract_strided_slice %28 {offsets = [0, 64], sizes = [2, 32], strides = [1, 1]} : vector<2x128xf32> to vector<2x32xf32>
    %32 = vector.extract_strided_slice %27 {offsets = [0, 96], sizes = [2, 32], strides = [1, 1]} : vector<2x128xf32> to vector<2x32xf32>
    %33 = arith.mulf %30, %18 : vector<2x32xf32>
    %34 = arith.mulf %29, %31 : vector<2x32xf32>
    %35 = arith.addf %33, %34 : vector<2x32xf32>
    %36 = math.tanh %35 : vector<2x32xf32>
    %37 = arith.mulf %32, %36 : vector<2x32xf32>
    %38 = vector.extract_strided_slice %8 {offsets = [2, 0], sizes = [2, 128], strides = [1, 1]} : vector<16x128xf32> to vector<2x128xf32>
    %39 = arith.truncf %37 : vector<2x32xf32> to vector<2x32xbf16>
    %cst_16 = arith.constant dense<0.000000e+00> : vector<2x128xf32>
    %40 = tpu.matmul %39, %16, %cst_16 {dimension_numbers = #tpu.dot_dimension_numbers<[1], [0], [0], [1], [0, 0, 1, 1], [], []>} : vector<2x32xbf16>, vector<32x128xbf16>, vector<2x128xf32> -> vector<2x128xf32>
    %41 = arith.addf %38, %40 : vector<2x128xf32>
    %42 = arith.negf %41 : vector<2x128xf32>
    %43 = math.exp %42 : vector<2x128xf32>
    %cst_17 = arith.constant 1.000000e+00 : f32
    %44 = vector.broadcast %cst_17 : f32 to vector<2x128xf32>
    %45 = arith.addf %44, %43 : vector<2x128xf32>
    %46 = arith.divf %44, %45 : vector<2x128xf32>
    %47 = math.tanh %41 : vector<2x128xf32>
    %48 = vector.extract_strided_slice %46 {offsets = [0, 0], sizes = [2, 32], strides = [1, 1]} : vector<2x128xf32> to vector<2x32xf32>
    %49 = vector.extract_strided_slice %46 {offsets = [0, 32], sizes = [2, 32], strides = [1, 1]} : vector<2x128xf32> to vector<2x32xf32>
    %50 = vector.extract_strided_slice %47 {offsets = [0, 64], sizes = [2, 32], strides = [1, 1]} : vector<2x128xf32> to vector<2x32xf32>
    %51 = vector.extract_strided_slice %46 {offsets = [0, 96], sizes = [2, 32], strides = [1, 1]} : vector<2x128xf32> to vector<2x32xf32>
    %52 = arith.mulf %49, %35 : vector<2x32xf32>
    %53 = arith.mulf %48, %50 : vector<2x32xf32>
    %54 = arith.addf %52, %53 : vector<2x32xf32>
    %55 = math.tanh %54 : vector<2x32xf32>
    %56 = arith.mulf %51, %55 : vector<2x32xf32>
    %57 = vector.extract_strided_slice %8 {offsets = [4, 0], sizes = [2, 128], strides = [1, 1]} : vector<16x128xf32> to vector<2x128xf32>
    %58 = arith.truncf %56 : vector<2x32xf32> to vector<2x32xbf16>
    %cst_18 = arith.constant dense<0.000000e+00> : vector<2x128xf32>
    %59 = tpu.matmul %58, %16, %cst_18 {dimension_numbers = #tpu.dot_dimension_numbers<[1], [0], [0], [1], [0, 0, 1, 1], [], []>} : vector<2x32xbf16>, vector<32x128xbf16>, vector<2x128xf32> -> vector<2x128xf32>
    %60 = arith.addf %57, %59 : vector<2x128xf32>
    %61 = arith.negf %60 : vector<2x128xf32>
    %62 = math.exp %61 : vector<2x128xf32>
    %cst_19 = arith.constant 1.000000e+00 : f32
    %63 = vector.broadcast %cst_19 : f32 to vector<2x128xf32>
    %64 = arith.addf %63, %62 : vector<2x128xf32>
    %65 = arith.divf %63, %64 : vector<2x128xf32>
    %66 = math.tanh %60 : vector<2x128xf32>
    %67 = vector.extract_strided_slice %65 {offsets = [0, 0], sizes = [2, 32], strides = [1, 1]} : vector<2x128xf32> to vector<2x32xf32>
    %68 = vector.extract_strided_slice %65 {offsets = [0, 32], sizes = [2, 32], strides = [1, 1]} : vector<2x128xf32> to vector<2x32xf32>
    %69 = vector.extract_strided_slice %66 {offsets = [0, 64], sizes = [2, 32], strides = [1, 1]} : vector<2x128xf32> to vector<2x32xf32>
    %70 = vector.extract_strided_slice %65 {offsets = [0, 96], sizes = [2, 32], strides = [1, 1]} : vector<2x128xf32> to vector<2x32xf32>
    %71 = arith.mulf %68, %54 : vector<2x32xf32>
    %72 = arith.mulf %67, %69 : vector<2x32xf32>
    %73 = arith.addf %71, %72 : vector<2x32xf32>
    %74 = math.tanh %73 : vector<2x32xf32>
    %75 = arith.mulf %70, %74 : vector<2x32xf32>
    %76 = vector.extract_strided_slice %8 {offsets = [6, 0], sizes = [2, 128], strides = [1, 1]} : vector<16x128xf32> to vector<2x128xf32>
    %77 = arith.truncf %75 : vector<2x32xf32> to vector<2x32xbf16>
    %cst_20 = arith.constant dense<0.000000e+00> : vector<2x128xf32>
    %78 = tpu.matmul %77, %16, %cst_20 {dimension_numbers = #tpu.dot_dimension_numbers<[1], [0], [0], [1], [0, 0, 1, 1], [], []>} : vector<2x32xbf16>, vector<32x128xbf16>, vector<2x128xf32> -> vector<2x128xf32>
    %79 = arith.addf %76, %78 : vector<2x128xf32>
    %80 = arith.negf %79 : vector<2x128xf32>
    %81 = math.exp %80 : vector<2x128xf32>
    %cst_21 = arith.constant 1.000000e+00 : f32
    %82 = vector.broadcast %cst_21 : f32 to vector<2x128xf32>
    %83 = arith.addf %82, %81 : vector<2x128xf32>
    %84 = arith.divf %82, %83 : vector<2x128xf32>
    %85 = math.tanh %79 : vector<2x128xf32>
    %86 = vector.extract_strided_slice %84 {offsets = [0, 0], sizes = [2, 32], strides = [1, 1]} : vector<2x128xf32> to vector<2x32xf32>
    %87 = vector.extract_strided_slice %84 {offsets = [0, 32], sizes = [2, 32], strides = [1, 1]} : vector<2x128xf32> to vector<2x32xf32>
    %88 = vector.extract_strided_slice %85 {offsets = [0, 64], sizes = [2, 32], strides = [1, 1]} : vector<2x128xf32> to vector<2x32xf32>
    %89 = vector.extract_strided_slice %84 {offsets = [0, 96], sizes = [2, 32], strides = [1, 1]} : vector<2x128xf32> to vector<2x32xf32>
    %90 = arith.mulf %87, %73 : vector<2x32xf32>
    %91 = arith.mulf %86, %88 : vector<2x32xf32>
    %92 = arith.addf %90, %91 : vector<2x32xf32>
    %93 = math.tanh %92 : vector<2x32xf32>
    %94 = arith.mulf %89, %93 : vector<2x32xf32>
    %95 = vector.extract_strided_slice %8 {offsets = [8, 0], sizes = [2, 128], strides = [1, 1]} : vector<16x128xf32> to vector<2x128xf32>
    %96 = arith.truncf %94 : vector<2x32xf32> to vector<2x32xbf16>
    %cst_22 = arith.constant dense<0.000000e+00> : vector<2x128xf32>
    %97 = tpu.matmul %96, %16, %cst_22 {dimension_numbers = #tpu.dot_dimension_numbers<[1], [0], [0], [1], [0, 0, 1, 1], [], []>} : vector<2x32xbf16>, vector<32x128xbf16>, vector<2x128xf32> -> vector<2x128xf32>
    %98 = arith.addf %95, %97 : vector<2x128xf32>
    %99 = arith.negf %98 : vector<2x128xf32>
    %100 = math.exp %99 : vector<2x128xf32>
    %cst_23 = arith.constant 1.000000e+00 : f32
    %101 = vector.broadcast %cst_23 : f32 to vector<2x128xf32>
    %102 = arith.addf %101, %100 : vector<2x128xf32>
    %103 = arith.divf %101, %102 : vector<2x128xf32>
    %104 = math.tanh %98 : vector<2x128xf32>
    %105 = vector.extract_strided_slice %103 {offsets = [0, 0], sizes = [2, 32], strides = [1, 1]} : vector<2x128xf32> to vector<2x32xf32>
    %106 = vector.extract_strided_slice %103 {offsets = [0, 32], sizes = [2, 32], strides = [1, 1]} : vector<2x128xf32> to vector<2x32xf32>
    %107 = vector.extract_strided_slice %104 {offsets = [0, 64], sizes = [2, 32], strides = [1, 1]} : vector<2x128xf32> to vector<2x32xf32>
    %108 = vector.extract_strided_slice %103 {offsets = [0, 96], sizes = [2, 32], strides = [1, 1]} : vector<2x128xf32> to vector<2x32xf32>
    %109 = arith.mulf %106, %92 : vector<2x32xf32>
    %110 = arith.mulf %105, %107 : vector<2x32xf32>
    %111 = arith.addf %109, %110 : vector<2x32xf32>
    %112 = math.tanh %111 : vector<2x32xf32>
    %113 = arith.mulf %108, %112 : vector<2x32xf32>
    %114 = vector.extract_strided_slice %8 {offsets = [10, 0], sizes = [2, 128], strides = [1, 1]} : vector<16x128xf32> to vector<2x128xf32>
    %115 = arith.truncf %113 : vector<2x32xf32> to vector<2x32xbf16>
    %cst_24 = arith.constant dense<0.000000e+00> : vector<2x128xf32>
    %116 = tpu.matmul %115, %16, %cst_24 {dimension_numbers = #tpu.dot_dimension_numbers<[1], [0], [0], [1], [0, 0, 1, 1], [], []>} : vector<2x32xbf16>, vector<32x128xbf16>, vector<2x128xf32> -> vector<2x128xf32>
    %117 = arith.addf %114, %116 : vector<2x128xf32>
    %118 = arith.negf %117 : vector<2x128xf32>
    %119 = math.exp %118 : vector<2x128xf32>
    %cst_25 = arith.constant 1.000000e+00 : f32
    %120 = vector.broadcast %cst_25 : f32 to vector<2x128xf32>
    %121 = arith.addf %120, %119 : vector<2x128xf32>
    %122 = arith.divf %120, %121 : vector<2x128xf32>
    %123 = math.tanh %117 : vector<2x128xf32>
    %124 = vector.extract_strided_slice %122 {offsets = [0, 0], sizes = [2, 32], strides = [1, 1]} : vector<2x128xf32> to vector<2x32xf32>
    %125 = vector.extract_strided_slice %122 {offsets = [0, 32], sizes = [2, 32], strides = [1, 1]} : vector<2x128xf32> to vector<2x32xf32>
    %126 = vector.extract_strided_slice %123 {offsets = [0, 64], sizes = [2, 32], strides = [1, 1]} : vector<2x128xf32> to vector<2x32xf32>
    %127 = vector.extract_strided_slice %122 {offsets = [0, 96], sizes = [2, 32], strides = [1, 1]} : vector<2x128xf32> to vector<2x32xf32>
    %128 = arith.mulf %125, %111 : vector<2x32xf32>
    %129 = arith.mulf %124, %126 : vector<2x32xf32>
    %130 = arith.addf %128, %129 : vector<2x32xf32>
    %131 = math.tanh %130 : vector<2x32xf32>
    %132 = arith.mulf %127, %131 : vector<2x32xf32>
    %133 = vector.extract_strided_slice %8 {offsets = [12, 0], sizes = [2, 128], strides = [1, 1]} : vector<16x128xf32> to vector<2x128xf32>
    %134 = arith.truncf %132 : vector<2x32xf32> to vector<2x32xbf16>
    %cst_26 = arith.constant dense<0.000000e+00> : vector<2x128xf32>
    %135 = tpu.matmul %134, %16, %cst_26 {dimension_numbers = #tpu.dot_dimension_numbers<[1], [0], [0], [1], [0, 0, 1, 1], [], []>} : vector<2x32xbf16>, vector<32x128xbf16>, vector<2x128xf32> -> vector<2x128xf32>
    %136 = arith.addf %133, %135 : vector<2x128xf32>
    %137 = arith.negf %136 : vector<2x128xf32>
    %138 = math.exp %137 : vector<2x128xf32>
    %cst_27 = arith.constant 1.000000e+00 : f32
    %139 = vector.broadcast %cst_27 : f32 to vector<2x128xf32>
    %140 = arith.addf %139, %138 : vector<2x128xf32>
    %141 = arith.divf %139, %140 : vector<2x128xf32>
    %142 = math.tanh %136 : vector<2x128xf32>
    %143 = vector.extract_strided_slice %141 {offsets = [0, 0], sizes = [2, 32], strides = [1, 1]} : vector<2x128xf32> to vector<2x32xf32>
    %144 = vector.extract_strided_slice %141 {offsets = [0, 32], sizes = [2, 32], strides = [1, 1]} : vector<2x128xf32> to vector<2x32xf32>
    %145 = vector.extract_strided_slice %142 {offsets = [0, 64], sizes = [2, 32], strides = [1, 1]} : vector<2x128xf32> to vector<2x32xf32>
    %146 = vector.extract_strided_slice %141 {offsets = [0, 96], sizes = [2, 32], strides = [1, 1]} : vector<2x128xf32> to vector<2x32xf32>
    %147 = arith.mulf %144, %130 : vector<2x32xf32>
    %148 = arith.mulf %143, %145 : vector<2x32xf32>
    %149 = arith.addf %147, %148 : vector<2x32xf32>
    %150 = math.tanh %149 : vector<2x32xf32>
    %151 = arith.mulf %146, %150 : vector<2x32xf32>
    %152 = vector.extract_strided_slice %8 {offsets = [14, 0], sizes = [2, 128], strides = [1, 1]} : vector<16x128xf32> to vector<2x128xf32>
    %153 = arith.truncf %151 : vector<2x32xf32> to vector<2x32xbf16>
    %cst_28 = arith.constant dense<0.000000e+00> : vector<2x128xf32>
    %154 = tpu.matmul %153, %16, %cst_28 {dimension_numbers = #tpu.dot_dimension_numbers<[1], [0], [0], [1], [0, 0, 1, 1], [], []>} : vector<2x32xbf16>, vector<32x128xbf16>, vector<2x128xf32> -> vector<2x128xf32>
    %155 = arith.addf %152, %154 : vector<2x128xf32>
    %156 = arith.negf %155 : vector<2x128xf32>
    %157 = math.exp %156 : vector<2x128xf32>
    %cst_29 = arith.constant 1.000000e+00 : f32
    %158 = vector.broadcast %cst_29 : f32 to vector<2x128xf32>
    %159 = arith.addf %158, %157 : vector<2x128xf32>
    %160 = arith.divf %158, %159 : vector<2x128xf32>
    %161 = math.tanh %155 : vector<2x128xf32>
    %162 = vector.extract_strided_slice %160 {offsets = [0, 0], sizes = [2, 32], strides = [1, 1]} : vector<2x128xf32> to vector<2x32xf32>
    %163 = vector.extract_strided_slice %160 {offsets = [0, 32], sizes = [2, 32], strides = [1, 1]} : vector<2x128xf32> to vector<2x32xf32>
    %164 = vector.extract_strided_slice %161 {offsets = [0, 64], sizes = [2, 32], strides = [1, 1]} : vector<2x128xf32> to vector<2x32xf32>
    %165 = vector.extract_strided_slice %160 {offsets = [0, 96], sizes = [2, 32], strides = [1, 1]} : vector<2x128xf32> to vector<2x32xf32>
    %166 = arith.mulf %163, %149 : vector<2x32xf32>
    %167 = arith.mulf %162, %164 : vector<2x32xf32>
    %168 = arith.addf %166, %167 : vector<2x32xf32>
    %169 = math.tanh %168 : vector<2x32xf32>
    %170 = arith.mulf %165, %169 : vector<2x32xf32>
    %171 = vector.extract_strided_slice %15 {offsets = [0, 0], sizes = [2, 128], strides = [1, 1]} : vector<8x128xf32> to vector<2x128xf32>
    %172 = arith.truncf %170 : vector<2x32xf32> to vector<2x32xbf16>
    %cst_30 = arith.constant dense<0.000000e+00> : vector<2x128xf32>
    %173 = tpu.matmul %172, %16, %cst_30 {dimension_numbers = #tpu.dot_dimension_numbers<[1], [0], [0], [1], [0, 0, 1, 1], [], []>} : vector<2x32xbf16>, vector<32x128xbf16>, vector<2x128xf32> -> vector<2x128xf32>
    %174 = arith.addf %171, %173 : vector<2x128xf32>
    %175 = arith.negf %174 : vector<2x128xf32>
    %176 = math.exp %175 : vector<2x128xf32>
    %cst_31 = arith.constant 1.000000e+00 : f32
    %177 = vector.broadcast %cst_31 : f32 to vector<2x128xf32>
    %178 = arith.addf %177, %176 : vector<2x128xf32>
    %179 = arith.divf %177, %178 : vector<2x128xf32>
    %180 = math.tanh %174 : vector<2x128xf32>
    %181 = vector.extract_strided_slice %179 {offsets = [0, 0], sizes = [2, 32], strides = [1, 1]} : vector<2x128xf32> to vector<2x32xf32>
    %182 = vector.extract_strided_slice %179 {offsets = [0, 32], sizes = [2, 32], strides = [1, 1]} : vector<2x128xf32> to vector<2x32xf32>
    %183 = vector.extract_strided_slice %180 {offsets = [0, 64], sizes = [2, 32], strides = [1, 1]} : vector<2x128xf32> to vector<2x32xf32>
    %184 = vector.extract_strided_slice %179 {offsets = [0, 96], sizes = [2, 32], strides = [1, 1]} : vector<2x128xf32> to vector<2x32xf32>
    %185 = arith.mulf %182, %168 : vector<2x32xf32>
    %186 = arith.mulf %181, %183 : vector<2x32xf32>
    %187 = arith.addf %185, %186 : vector<2x32xf32>
    %188 = math.tanh %187 : vector<2x32xf32>
    %189 = arith.mulf %184, %188 : vector<2x32xf32>
    %190 = vector.extract_strided_slice %15 {offsets = [2, 0], sizes = [2, 128], strides = [1, 1]} : vector<8x128xf32> to vector<2x128xf32>
    %191 = arith.truncf %189 : vector<2x32xf32> to vector<2x32xbf16>
    %cst_32 = arith.constant dense<0.000000e+00> : vector<2x128xf32>
    %192 = tpu.matmul %191, %16, %cst_32 {dimension_numbers = #tpu.dot_dimension_numbers<[1], [0], [0], [1], [0, 0, 1, 1], [], []>} : vector<2x32xbf16>, vector<32x128xbf16>, vector<2x128xf32> -> vector<2x128xf32>
    %193 = arith.addf %190, %192 : vector<2x128xf32>
    %194 = arith.negf %193 : vector<2x128xf32>
    %195 = math.exp %194 : vector<2x128xf32>
    %cst_33 = arith.constant 1.000000e+00 : f32
    %196 = vector.broadcast %cst_33 : f32 to vector<2x128xf32>
    %197 = arith.addf %196, %195 : vector<2x128xf32>
    %198 = arith.divf %196, %197 : vector<2x128xf32>
    %199 = math.tanh %193 : vector<2x128xf32>
    %200 = vector.extract_strided_slice %198 {offsets = [0, 0], sizes = [2, 32], strides = [1, 1]} : vector<2x128xf32> to vector<2x32xf32>
    %201 = vector.extract_strided_slice %198 {offsets = [0, 32], sizes = [2, 32], strides = [1, 1]} : vector<2x128xf32> to vector<2x32xf32>
    %202 = vector.extract_strided_slice %199 {offsets = [0, 64], sizes = [2, 32], strides = [1, 1]} : vector<2x128xf32> to vector<2x32xf32>
    %203 = vector.extract_strided_slice %198 {offsets = [0, 96], sizes = [2, 32], strides = [1, 1]} : vector<2x128xf32> to vector<2x32xf32>
    %204 = arith.mulf %201, %187 : vector<2x32xf32>
    %205 = arith.mulf %200, %202 : vector<2x32xf32>
    %206 = arith.addf %204, %205 : vector<2x32xf32>
    %207 = math.tanh %206 : vector<2x32xf32>
    %208 = arith.mulf %203, %207 : vector<2x32xf32>
    %209 = vector.extract_strided_slice %15 {offsets = [4, 0], sizes = [2, 128], strides = [1, 1]} : vector<8x128xf32> to vector<2x128xf32>
    %210 = arith.truncf %208 : vector<2x32xf32> to vector<2x32xbf16>
    %cst_34 = arith.constant dense<0.000000e+00> : vector<2x128xf32>
    %211 = tpu.matmul %210, %16, %cst_34 {dimension_numbers = #tpu.dot_dimension_numbers<[1], [0], [0], [1], [0, 0, 1, 1], [], []>} : vector<2x32xbf16>, vector<32x128xbf16>, vector<2x128xf32> -> vector<2x128xf32>
    %212 = arith.addf %209, %211 : vector<2x128xf32>
    %213 = arith.negf %212 : vector<2x128xf32>
    %214 = math.exp %213 : vector<2x128xf32>
    %cst_35 = arith.constant 1.000000e+00 : f32
    %215 = vector.broadcast %cst_35 : f32 to vector<2x128xf32>
    %216 = arith.addf %215, %214 : vector<2x128xf32>
    %217 = arith.divf %215, %216 : vector<2x128xf32>
    %218 = math.tanh %212 : vector<2x128xf32>
    %219 = vector.extract_strided_slice %217 {offsets = [0, 0], sizes = [2, 32], strides = [1, 1]} : vector<2x128xf32> to vector<2x32xf32>
    %220 = vector.extract_strided_slice %217 {offsets = [0, 32], sizes = [2, 32], strides = [1, 1]} : vector<2x128xf32> to vector<2x32xf32>
    %221 = vector.extract_strided_slice %218 {offsets = [0, 64], sizes = [2, 32], strides = [1, 1]} : vector<2x128xf32> to vector<2x32xf32>
    %222 = vector.extract_strided_slice %217 {offsets = [0, 96], sizes = [2, 32], strides = [1, 1]} : vector<2x128xf32> to vector<2x32xf32>
    %223 = arith.mulf %220, %206 : vector<2x32xf32>
    %224 = arith.mulf %219, %221 : vector<2x32xf32>
    %225 = arith.addf %223, %224 : vector<2x32xf32>
    %226 = math.tanh %225 : vector<2x32xf32>
    %227 = arith.mulf %222, %226 : vector<2x32xf32>
    %228 = vector.extract_strided_slice %15 {offsets = [6, 0], sizes = [2, 128], strides = [1, 1]} : vector<8x128xf32> to vector<2x128xf32>
    %229 = arith.truncf %227 : vector<2x32xf32> to vector<2x32xbf16>
    %cst_36 = arith.constant dense<0.000000e+00> : vector<2x128xf32>
    %230 = tpu.matmul %229, %16, %cst_36 {dimension_numbers = #tpu.dot_dimension_numbers<[1], [0], [0], [1], [0, 0, 1, 1], [], []>} : vector<2x32xbf16>, vector<32x128xbf16>, vector<2x128xf32> -> vector<2x128xf32>
    %231 = arith.addf %228, %230 : vector<2x128xf32>
    %232 = arith.negf %231 : vector<2x128xf32>
    %233 = math.exp %232 : vector<2x128xf32>
    %cst_37 = arith.constant 1.000000e+00 : f32
    %234 = vector.broadcast %cst_37 : f32 to vector<2x128xf32>
    %235 = arith.addf %234, %233 : vector<2x128xf32>
    %236 = arith.divf %234, %235 : vector<2x128xf32>
    %237 = math.tanh %231 : vector<2x128xf32>
    %238 = vector.extract_strided_slice %236 {offsets = [0, 0], sizes = [2, 32], strides = [1, 1]} : vector<2x128xf32> to vector<2x32xf32>
    %239 = vector.extract_strided_slice %236 {offsets = [0, 32], sizes = [2, 32], strides = [1, 1]} : vector<2x128xf32> to vector<2x32xf32>
    %240 = vector.extract_strided_slice %237 {offsets = [0, 64], sizes = [2, 32], strides = [1, 1]} : vector<2x128xf32> to vector<2x32xf32>
    %241 = vector.extract_strided_slice %236 {offsets = [0, 96], sizes = [2, 32], strides = [1, 1]} : vector<2x128xf32> to vector<2x32xf32>
    %242 = arith.mulf %239, %225 : vector<2x32xf32>
    %243 = arith.mulf %238, %240 : vector<2x32xf32>
    %244 = arith.addf %242, %243 : vector<2x32xf32>
    %245 = math.tanh %244 : vector<2x32xf32>
    %246 = arith.mulf %241, %245 : vector<2x32xf32>
    %247 = arith.truncf %246 : vector<2x32xf32> to vector<2x32xbf16>
    %c0_38 = arith.constant 0 : index
    %c0_39 = arith.constant 0 : index
    %248 = vector.load %arg6[%c0_38, %c0_39] : memref<32x3xbf16, #tpu.memory_space<vmem>>, vector<32x3xbf16>
    %cst_40 = arith.constant dense<0.000000e+00> : vector<2x3xf32>
    %249 = tpu.matmul %247, %248, %cst_40 {dimension_numbers = #tpu.dot_dimension_numbers<[1], [0], [0], [1], [0, 0, 1, 1], [], []>} : vector<2x32xbf16>, vector<32x3xbf16>, vector<2x3xf32> -> vector<2x3xf32>
    %c0_41 = arith.constant 0 : index
    %c0_42 = arith.constant 0 : index
    %250 = vector.load %arg7[%c0_41, %c0_42] : memref<1x3xf32, #tpu.memory_space<vmem>>, vector<1x3xf32>
    %251 = vector.broadcast %250 : vector<1x3xf32> to vector<2x3xf32>
    %252 = arith.addf %249, %251 : vector<2x3xf32>
    %c0_43 = arith.constant 0 : index
    %c0_44 = arith.constant 0 : index
    %253 = vector.load %arg9[%c0_43, %c0_44] : memref<2x3xf32, #tpu.memory_space<vmem>>, vector<2x3xf32>
    tpu.vector_store %arg9[%c0_43, %c0_44], %252 {strides = array<i32>} : memref<2x3xf32, #tpu.memory_space<vmem>>, vector<2x3xf32>,
    %cst_45 = arith.constant dense<0xFF800000> : vector<2xf32>
    %254 = vector.multi_reduction <maximumf>, %252, %cst_45 [1] : vector<2x3xf32> to vector<2xf32>
    %255 = vector.shape_cast %254 : vector<2xf32> to vector<2x1xf32>
    %256 = vector.broadcast %255 : vector<2x1xf32> to vector<2x3xf32>
    %257 = arith.subf %252, %256 : vector<2x3xf32>
    %258 = math.exp %257 : vector<2x3xf32>
    %cst_46 = arith.constant dense<0.000000e+00> : vector<2xf32>
    %259 = vector.multi_reduction <add>, %258, %cst_46 [1] : vector<2x3xf32> to vector<2xf32>
    %260 = vector.shape_cast %259 : vector<2xf32> to vector<2x1xf32>
    %261 = math.log %260 : vector<2x1xf32>
    %262 = vector.broadcast %261 : vector<2x1xf32> to vector<2x3xf32>
    %263 = arith.subf %257, %262 : vector<2x3xf32>
    %264 = tpu.iota {dimensions = array<i32: 1>} : vector<2x3xi32>
    %c0_47 = arith.constant 0 : index
    %c0_48 = arith.constant 0 : index
    %265 = vector.load %arg8[%c0_47, %c0_48] : memref<2x1xi32, #tpu.memory_space<vmem>>, vector<2x1xi32>
    %266 = vector.broadcast %265 : vector<2x1xi32> to vector<2x3xi32>
    %267 = arith.cmpi eq, %264, %266 : vector<2x3xi32>
    %cst_49 = arith.constant 0.000000e+00 : f32
    %268 = vector.broadcast %cst_49 : f32 to vector<2x3xf32>
    %269 = arith.select %267, %263, %268 : vector<2x3xi1>, vector<2x3xf32>
    %cst_50 = arith.constant dense<0.000000e+00> : vector<2xf32>
    %270 = vector.multi_reduction <add>, %269, %cst_50 [1] : vector<2x3xf32> to vector<2xf32>
    %271 = vector.shape_cast %270 : vector<2xf32> to vector<2x1xf32>
    %cst_51 = arith.constant dense<0.000000e+00> : vector<1xf32>
    %272 = vector.multi_reduction <add>, %271, %cst_51 [0] : vector<2x1xf32> to vector<1xf32>
    %273 = vector.shape_cast %272 : vector<1xf32> to vector<1x1xf32>
    %cst_52 = arith.constant 0.000000e+00 : f32
    %274 = vector.broadcast %cst_52 : f32 to vector<1x1xf32>
    %275 = arith.subf %274, %273 : vector<1x1xf32>
    %cst_53 = arith.constant 5.000000e-01 : f32
    %276 = vector.broadcast %cst_53 : f32 to vector<1x1xf32>
    %277 = arith.mulf %275, %276 : vector<1x1xf32>
    %c0_54 = arith.constant 0 : index
    %c0_55 = arith.constant 0 : index
    %278 = vector.load %arg10[%c0_54, %c0_55] : memref<1x1xf32, #tpu.memory_space<vmem>>, vector<1x1xf32>
    tpu.vector_store %arg10[%c0_54, %c0_55], %277 {strides = array<i32>} : memref<1x1xf32, #tpu.memory_space<vmem>>, vector<1x1xf32>,
    return
  }
}

</mosaic_0001>

<bundles_post_ra>
// kernel: tpu_custom_call.1
= control target key start
LH: loop header
LB: loop body
LE: loop exit
PB: predicated region body
PF: predicated region fallthrough
CT: control target
= control target key end

     0   :  { %16 = vsyncpa [#allocation3], 0  ;;  %s2071_s0 = inlined_call_operand.vmem [shape: s32[16,1], index: 0, kind: input, shape index: {}]   ;;  %s2072_s1 = inlined_call_operand.vmem [shape: f32[8,20], index: 1, kind: input, shape index: {}]   ;;  %s2073_s2 = inlined_call_operand.hbm [shape: bf16[128,128], index: 2, kind: input, shape index: {}]   ;;  %s2074_s3 = inlined_call_operand.vmem [shape: bf16[20,128], index: 3, kind: input, shape index: {}]   ;;  %s2075_s4 = inlined_call_operand.vmem [shape: f32[1,128], index: 4, kind: input, shape index: {}]   ;;  %s2076_s5 = inlined_call_operand.vmem [shape: bf16[32,128], index: 5, kind: input, shape index: {}]   ;;  %s2077_s6 = inlined_call_operand.vmem [shape: bf16[32,3], index: 6, kind: input, shape index: {}]   ;;  %s2078_s7 = inlined_call_operand.vmem [shape: f32[1,3], index: 7, kind: input, shape index: {}]   ;;  %s2079_s8 = inlined_call_operand.vmem [shape: s32[2,1], index: 8, kind: input, shape index: {}]   ;;  %s2080_s9 = inlined_call_operand.hbm [shape: f32[2,3], index: 9, kind: output, shape index: {0}]   ;;  %s2081_s10 = inlined_call_operand.hbm [shape: f32[1,1], index: 10, kind: output, shape index: {1}]  }
   0x1   :  { %17 = vsyncpa [#allocation4], 0 }
   0x2   :  { %18 = vsyncpa [#allocation7], 0  ;;  %s1746_s13 = smov [#allocation2]   ;;  %s1674_s17 = scalar_lea.hbm %s2073_s2, 1024 }
   0x3   :  { %s28_s14 = sshll.u32 %s1746_s13, 4  ;;  %p1675_p0 = scmp.ne.s32.totalorder %s2073_s2, %s1674_s17  ;;  %s29_s14 = int_to_ptr.vmem [resolvable:$true] %s28_s14 }
   0x4   :  { %p1678_p1 = scmp.lt.u32.totalorder %s1674_s17, %s2073_s2 }
   0x6   :  { %p1680_p2 = pnand %p1678_p1, %p1675_p0 }
   0x8   :  { %1683 = shalt.err (!%p1680_p2)
}
   0x9   :  { %s1684_s22 = scalar_lea.vmem %s29_s14, 1024  ;;  %p1689_p4 = scmp.lt.s32.totalorder %s29_s14, %s29_s14 }
   0xa   :  { %p1685_p3 = scmp.ne.s32.totalorder %s29_s14, %s1684_s22  ;;  %p1690_p5 = scmp.lt.s32.totalorder %s1684_s22, %s1684_s22 }
   0xc   :  { %p1691_p6 = por %p1690_p5, %p1689_p4 }
   0xe   :  { %p1692_p7 = pnand %p1691_p6, %p1685_p3 }
  0x10   :  { %1695 = shalt.err (!%p1692_p7)
}
  0x11   :  { %s1747_s23 = smov 64   ;;  %s1748_s24 = smov 4  }
  0x12   :  { %34 = dma.hbm_to_vmem [thread:$0]  %s2073_s2, 1024, %s29_s14, [#allocation3], %s1747_s23, %s1747_s23, %s1748_s24  }
  0x13   :  { %1740 = dma.done.wait [#allocation3], 1024  }
  0x14   :  { %1741 = vsyncadd [#allocation3], 4294966272  ;;  %v1749_v0 = vmov 0   ;;  %v1750_v1 = vmov 0.0   ;;  %vm1751_vm0 = vmmov 0   ;;  %v51_v2 = vld [vmem:[%s2071_s0] sm:$0xff]  ;;  %v53_v19 = vlaneseq }
  0x15   :  { %1559 = vset.pattern.permute.xlu0 %v1749_v0  ;;  %1417 = vmatprep.subr.bf16.mxu0 %v1750_v1  ;;  %v1560_v3 = vld [vmem:[#allocation2] sm:$0xff]   ;;  %v52_v4 = vld [vmem:[%s2071_s0 + $0x8] sm:$0xff]  ;;  %vm198_vm1 = vcmask 1041408   ;;  %v1562_v7 = vld [vmem:[#allocation2 + $0x10] sm:$0xff]   ;;  %vm194_vm2 = vcmask 162816   ;;  %vm258_vm6 = vcmask 261120  }
  0x16   :  { %1437 = vmatprep.subr.bf16.mxu1 %v1750_v1  ;;  %1441 = vmatprep.mubr.msk.bf16.mxu1 %vm1751_vm0, %v1750_v1  ;;  %v1561_v5 = vld [vmem:[#allocation2 + $0x8] sm:$0xff]   ;;  %v1564_v6 = vld [vmem:[%s2074_s3] sm:$0xff]   ;;  %v1563_v11 = vld [vmem:[#allocation2 + $0x18] sm:$0xff]   ;;  %v1879_v21 = vand.u32 127, %v53_v19  ;;  %v1752_v23 = vmov 1.0|1.0  }
  0x17   :  { %1433 = vmatprep.mubr.msk.bf16.mxu0 %vm1751_vm0, %v1750_v1  ;;  %56 = vperm.xlu0 %1559, %v51_v2   ;;  %v1566_v8 = vld [vmem:[%s2074_s3 + $0x8] ss:$0 sps:$4 sm:$0x33]   ;;  %v173_v9 = vld [vmem:[%s2072_s1] sm:$0xff]  ;;  %v1569_v17 = vld [vmem:[#allocation2 + $0x30] sm:$0xff]   ;;  %vm1258_vm7 = vcmask 17408  }
  0x18   :  { %1418 = vmatpush3.bf16.msra.mxu0 %v1560_v3  ;;  %1438 = vmatpush3.bf16.msra.mxu1 %v1564_v6  ;;  %v200_v10 = vsel %vm198_vm1, %v1566_v8, 0  ;;  %v174_v12 = vpack.c.bf16 %v173_v9, %v173_v9  ;;  %v1853_v13 = vld [vmem:[%s2076_s5] sm:$0xff]   ;;  %v1861_v15 = vld [vmem:[%s2076_s5 + $0x8] sm:$0xff]   ;;  %v1571_v18 = vld [vmem:[#allocation2 + $0x38] sm:$0xff]   ;;  %s1753_s5 = smov 32  }
  0x19   :  { %1419 = vmatprep.subr.bf16.mxu0 %v1750_v1  ;;  %1439 = vmatprep.subr.bf16.mxu1 %v1750_v1  ;;  %v1565_v14 = vld [vmem:[#allocation2 + $0x20] sm:$0xff]   ;;  %v1567_v16 = vld [vmem:[#allocation2 + $0x28] sm:$0xff]  }
  0x1b   :  { %59 = vperm.xlu0 %1559, %v52_v4  }
  0x1c   :  { %1420 = vmatpush3.bf16.msra.mxu0 %v1561_v5  ;;  %1440 = vmatpush3.bf16.msra.mxu1 %v200_v10 }
  0x1d   :  { %1421 = vmatprep.subr.bf16.mxu0 %v1750_v1  ;;  %1445 = vmatprep.subr.bf16.mxu1 %v1750_v1 }
  0x1f   :  { %1442 = vmatmul.mubr.msk.bf16.vlgmr.msra.gmra.mrb[0].mxu1 %vm194_vm2, %v174_v12 }
  0x20   :  { %1422 = vmatpush3.bf16.msra.mxu0 %v1562_v7  ;;  %1446 = vmatpush3.bf16.msra.mxu1 %v1853_v13 }
  0x21   :  { %1423 = vmatprep.subr.bf16.mxu0 %v1750_v1  ;;  %1447 = vmatprep.subr.bf16.mxu1 %v1750_v1 }
  0x22   :  { %1449 = vmatprep.mubr.msk.bf16.mxu1 %vm1751_vm0, %v1750_v1 }
  0x24   :  { %1424 = vmatpush3.bf16.msra.mxu0 %v1563_v11  ;;  %1448 = vmatpush3.bf16.msra.mxu1 %v1861_v15 }
  0x25   :  { %1425 = vmatprep.subr.bf16.mxu0 %v1750_v1  ;;  %1453 = vmatprep.subr.bf16.mxu1 %v1750_v1 }
  0x27   :  { %1450 = vmatmul.mubr.bf16.vlgmr.msra.gmra.mrb[4].mxu1 %v1749_v0 }
  0x28   :  { %1426 = vmatpush3.bf16.msra.mxu0 %v1565_v14  ;;  %1454 = vmatpush3.bf16.msra.mxu1 %v1853_v13 }
  0x29   :  { %1427 = vmatprep.subr.bf16.mxu0 %v1750_v1  ;;  %1455 = vmatprep.subr.bf16.mxu1 %v1750_v1 }
  0x2a   :  { %1457 = vmatprep.mubr.msk.bf16.mxu1 %vm1751_vm0, %v1750_v1 }
  0x2c   :  { %1428 = vmatpush3.bf16.msra.mxu0 %v1567_v16  ;;  %1456 = vmatpush3.bf16.msra.mxu1 %v1861_v15 }
  0x2d   :  { %1429 = vmatprep.subr.bf16.mxu0 %v1750_v1  ;;  %1461 = vmatprep.subr.bf16.mxu1 %v1750_v1 }
  0x30   :  { %1430 = vmatpush3.bf16.msra.mxu0 %v1569_v17 }
  0x31   :  { %1431 = vmatprep.subr.bf16.mxu0 %v1750_v1 }
  0x34   :  { %1432 = vmatpush3.bf16.msra.mxu0 %v1571_v18 }
  0x35   :  { %1469 = vmatprep.subr.bf16.mxu0 %v1750_v1 }
  0x96   :  { %v57_v20 = vpop.permute.xlu0 %56 }
  0x97   :  { %vm61_vm3 = vcmp.eq.s32.totalorder %v1879_v21, %v57_v20 }
  0x9a   :  { %v60_v22 = vpop.permute.xlu0 %59 }
  0x9b   :  { %vm62_vm4 = vcmp.eq.s32.totalorder %v1879_v21, %v60_v22 }
  0x9c   :  { %vm1331_vm5 = vmpackc.low %vm62_vm4, %vm61_vm3 }
  0x9d   :  { %1434 = vmatmul.mubr.msk.bf16.vlgmr.msra.gmra.mrb[0].mxu0 %vm1331_vm5, %v1752_v23 }
  0x9e   :  { %1470 = vmatpush3.bf16.msra.mxu0 %v1853_v13  ;;  %1473 = vmatprep.mubr.msk.bf16.mxu0 %vm1751_vm0, %v1750_v1 }
  0x9f   :  { %1471 = vmatprep.subr.bf16.mxu0 %v1750_v1 }
  0xa2   :  { %1472 = vmatpush3.bf16.msra.mxu0 %v1861_v15 }
  0xa3   :  { %1485 = vmatprep.subr.bf16.mxu0 %v1750_v1 }
  0xf2   :  { %v1889_v24 = vpop.f32.mrb[0].mxu1 }
  0xf3   :  { %v1443_v25 = vpop.f32.mrb[1].mxu1 }
  0xf4   :  { %v239_v26 = vpop.f32.mrb[2].mxu1 }
  0xf5   :  { %v1444_v27 = vpop.f32.mrb[3].mxu1 }
  0xfa   :  { %v296_v28 = vpop.f32.mrb[4].mxu1 }
  0xfb   :  { %v1451_v29 = vpop.f32.mrb[5].mxu1 }
  0xfc   :  { %v299_v30 = vpop.f32.mrb[6].mxu1 }
  0xfd   :  { %v1452_v31 = vpop.f32.mrb[7].mxu1 }
 0x170   :  { %v1891_v32 = vpop.f32.mrb[0].mxu0 }
 0x171   :  { %v1435_v33 = vpop.f32.mrb[1].mxu0  ;;  %v302_v34 = vadd.f32 %v296_v28, %v1891_v32 }
 0x172   :  { %v1894_v35 = vpop.f32.mrb[2].mxu0 }
 0x173   :  { %v1436_v36 = vpop.f32.mrb[3].mxu0  ;;  %1574 = vtanh.f32 %v302_v34  ;;  %v1339_v38 = vmul.f32 -1.442695, %v302_v34 }
 0x175   :  { %1576 = vpow2.f32 %v1339_v38 }
 0x17d   :  { %v1575_v37 = vpop.eup %1574 }
 0x17e   :  { %312 = vrot.lane.b32.xlu1 %v1575_v37, %s1747_s23 }
 0x17f   :  { %v1577_v39 = vpop.eup %1576 }
 0x180   :  { %v306_v40 = vadd.f32 1.0, %v1577_v39 }
 0x182   :  { %1578 = vrcp.f32 %v306_v40 }
 0x18c   :  { %v1579_v41 = vpop.eup %1578 }
 0x18d   :  { %v310_v44 = vmul.f32 0.0, %v1579_v41 }
 0x1f0   :  { %v313_v42 = vpop.permute.xlu1 %312 }
 0x1f1   :  { %v315_v43 = vmul.f32 %v1579_v41, %v313_v42 }
 0x1f3   :  { %317 = vrot.lane.b32.xlu1 %v315_v43, %s1753_s5 }
 0x265   :  { %v318_v45 = vpop.permute.xlu1 %317 }
 0x266   :  { %v320_v46 = vadd.f32 %v318_v45, %v310_v44 }
 0x268   :  { %1580 = vtanh.f32 %v320_v46  ;;  %v386_v2 = vrot.slane %v320_v46, 6 }
 0x272   :  { %v1581_v47 = vpop.eup %1580 }
 0x273   :  { %323 = vrot.lane.b32.xlu0 %v1581_v47, %s1747_s23 }
 0x2e5   :  { %v324_v48 = vpop.permute.xlu0 %323 }
 0x2e6   :  { %v326_v49 = vmul.f32 %v1579_v41, %v324_v48 }
 0x2e8   :  { %v327_v50 = vpack.c.bf16 %v326_v49, %v326_v49 }
 0x2ea   :  { %329 = vrot.lane.b32.xlu1 %v327_v50, %s1753_s5 }
 0x35c   :  { %v330_v51 = vpop.permute.xlu1 %329 }
 0x35d   :  { %1458 = vmatmul.mubr.msk.bf16.vlgmr.msra.gmra.mrb[8].mxu1 %vm258_vm6, %v330_v51 }
 0x35e   :  { %1462 = vmatpush3.bf16.msra.mxu1 %v1853_v13  ;;  %1465 = vmatprep.mubr.msk.bf16.mxu1 %vm1751_vm0, %v1750_v1 }
 0x35f   :  { %1463 = vmatprep.subr.bf16.mxu1 %v1750_v1 }
 0x362   :  { %1464 = vmatpush3.bf16.msra.mxu1 %v1861_v15 }
 0x363   :  { %1477 = vmatprep.subr.bf16.mxu1 %v1750_v1 }
 0x430   :  { %v368_v52 = vpop.f32.mrb[8].mxu1 }
 0x431   :  { %v375_v53 = vrot.slane %v368_v52, 6  ;;  %v1459_v54 = vpop.f32.mrb[9].mxu1 }
 0x432   :  { %v371_v55 = vpop.f32.mrb[10].mxu1 }
 0x433   :  { %v377_v56 = vadd.f32 %v375_v53, %v1891_v32  ;;  %v1460_v57 = vpop.f32.mrb[11].mxu1 }
 0x435   :  { %1582 = vtanh.f32 %v377_v56  ;;  %v1341_v59 = vmul.f32 -1.442695, %v377_v56 }
 0x437   :  { %1584 = vpow2.f32 %v1341_v59 }
 0x43f   :  { %v1583_v58 = vpop.eup %1582 }
 0x440   :  { %390 = vrot.lane.b32.xlu0 %v1583_v58, %s1747_s23 }
 0x441   :  { %v1585_v60 = vpop.eup %1584 }
 0x442   :  { %v381_v61 = vadd.f32 1.0, %v1585_v60 }
 0x444   :  { %1586 = vrcp.f32 %v381_v61 }
 0x44e   :  { %v1587_v62 = vpop.eup %1586 }
 0x44f   :  { %v388_v3 = vmul.f32 %v1587_v62, %v386_v2 }
 0x4b2   :  { %v391_v63 = vpop.permute.xlu0 %390 }
 0x4b3   :  { %v393_v0 = vmul.f32 %v1587_v62, %v391_v63 }
 0x4b5   :  { %395 = vrot.lane.b32.xlu1 %v393_v0, %s1753_s5 }
 0x527   :  { %v396_v4 = vpop.permute.xlu1 %395 }
 0x528   :  { %v398_v5 = vadd.f32 %v396_v4, %v388_v3 }
 0x52a   :  { %1588 = vtanh.f32 %v398_v5  ;;  %v465_v29 = vrot.slane %v398_v5, 6 }
 0x534   :  { %v1589_v6 = vpop.eup %1588 }
 0x535   :  { %401 = vrot.lane.b32.xlu0 %v1589_v6, %s1747_s23 }
 0x5a7   :  { %v402_v7 = vpop.permute.xlu0 %401 }
 0x5a8   :  { %v404_v8 = vmul.f32 %v1587_v62, %v402_v7 }
 0x5aa   :  { %v405_v9 = vpack.c.bf16 %v404_v8, %v404_v8 }
 0x5ac   :  { %v407_v10 = vrot.slane %v405_v9, 1 }
 0x5ae   :  { %408 = vrot.lane.b32.xlu1 %v407_v10, %s1753_s5 }
 0x620   :  { %v409_v11 = vpop.permute.xlu1 %408 }
 0x621   :  { %1466 = vmatmul.mubr.msk.bf16.vlgmr.msra.gmra.mrb[12].mxu1 %vm258_vm6, %v409_v11 }
 0x622   :  { %1478 = vmatpush3.bf16.msra.mxu1 %v1853_v13  ;;  %1481 = vmatprep.mubr.msk.bf16.mxu1 %vm1751_vm0, %v1750_v1 }
 0x623   :  { %1479 = vmatprep.subr.bf16.mxu1 %v1750_v1 }
 0x626   :  { %1480 = vmatpush3.bf16.msra.mxu1 %v1861_v15 }
 0x627   :  { %1493 = vmatprep.subr.bf16.mxu1 %v1750_v1 }
 0x6f4   :  { %v447_v12 = vpop.f32.mrb[12].mxu1 }
 0x6f5   :  { %v454_v14 = vrot.slane %v447_v12, 4  ;;  %v1467_v16 = vpop.f32.mrb[13].mxu1 }
 0x6f6   :  { %v450_v17 = vpop.f32.mrb[14].mxu1 }
 0x6f7   :  { %v456_v18 = vadd.f32 %v454_v14, %v1891_v32  ;;  %v1468_v19 = vpop.f32.mrb[15].mxu1 }
 0x6f9   :  { %1590 = vtanh.f32 %v456_v18  ;;  %v1343_v22 = vmul.f32 -1.442695, %v456_v18 }
 0x6fb   :  { %1592 = vpow2.f32 %v1343_v22 }
 0x703   :  { %v1591_v20 = vpop.eup %1590 }
 0x704   :  { %469 = vrot.lane.b32.xlu0 %v1591_v20, %s1747_s23 }
 0x705   :  { %v1593_v23 = vpop.eup %1592 }
 0x706   :  { %v460_v25 = vadd.f32 1.0, %v1593_v23 }
 0x708   :  { %1594 = vrcp.f32 %v460_v25 }
 0x712   :  { %v1595_v26 = vpop.eup %1594 }
 0x713   :  { %v467_v30 = vmul.f32 %v1595_v26, %v465_v29 }
 0x776   :  { %v470_v27 = vpop.permute.xlu0 %469 }
 0x777   :  { %v472_v28 = vmul.f32 %v1595_v26, %v470_v27 }
 0x779   :  { %474 = vrot.lane.b32.xlu1 %v472_v28, %s1753_s5 }
 0x7eb   :  { %v475_v31 = vpop.permute.xlu1 %474 }
 0x7ec   :  { %v477_v33 = vadd.f32 %v475_v31, %v467_v30 }
 0x7ee   :  { %1596 = vtanh.f32 %v477_v33  ;;  %v544_v54 = vrot.slane %v477_v33, 6 }
 0x7f8   :  { %v1597_v34 = vpop.eup %1596 }
 0x7f9   :  { %480 = vrot.lane.b32.xlu0 %v1597_v34, %s1747_s23 }
 0x86b   :  { %v481_v36 = vpop.permute.xlu0 %480 }
 0x86c   :  { %v483_v37 = vmul.f32 %v1595_v26, %v481_v36 }
 0x86e   :  { %v484_v38 = vpack.c.bf16 %v483_v37, %v483_v37 }
 0x870   :  { %v486_v39 = vrot.slane %v484_v38, 2 }
 0x872   :  { %487 = vrot.lane.b32.xlu1 %v486_v39, %s1753_s5 }
 0x8e4   :  { %v488_v40 = vpop.permute.xlu1 %487 }
 0x8e5   :  { %1474 = vmatmul.mubr.msk.bf16.vlgmr.msra.gmra.mrb[4].mxu0 %vm258_vm6, %v488_v40 }
 0x8e6   :  { %1486 = vmatpush3.bf16.msra.mxu0 %v1853_v13  ;;  %1489 = vmatprep.mubr.msk.bf16.mxu0 %vm1751_vm0, %v1750_v1 }
 0x8e7   :  { %1487 = vmatprep.subr.bf16.mxu0 %v1750_v1 }
 0x8ea   :  { %1488 = vmatpush3.bf16.msra.mxu0 %v1861_v15 }
 0x8eb   :  { %1501 = vmatprep.subr.bf16.mxu0 %v1750_v1 }
 0x9b8   :  { %v526_v41 = vpop.f32.mrb[4].mxu0 }
 0x9b9   :  { %v533_v42 = vrot.slane %v526_v41, 2  ;;  %v1475_v43 = vpop.f32.mrb[5].mxu0 }
 0x9ba   :  { %v529_v44 = vpop.f32.mrb[6].mxu0 }
 0x9bb   :  { %v535_v45 = vadd.f32 %v533_v42, %v1891_v32  ;;  %v1476_v46 = vpop.f32.mrb[7].mxu0 }
 0x9bd   :  { %1598 = vtanh.f32 %v535_v45  ;;  %v1345_v48 = vmul.f32 -1.442695, %v535_v45 }
 0x9bf   :  { %1600 = vpow2.f32 %v1345_v48 }
 0x9c7   :  { %v1599_v47 = vpop.eup %1598 }
 0x9c8   :  { %548 = vrot.lane.b32.xlu0 %v1599_v47, %s1747_s23 }
 0x9c9   :  { %v1601_v49 = vpop.eup %1600 }
 0x9ca   :  { %v539_v50 = vadd.f32 1.0, %v1601_v49 }
 0x9cc   :  { %1602 = vrcp.f32 %v539_v50 }
 0x9d6   :  { %v1603_v51 = vpop.eup %1602 }
 0x9d7   :  { %v546_v55 = vmul.f32 %v1603_v51, %v544_v54 }
 0xa3a   :  { %v549_v52 = vpop.permute.xlu0 %548 }
 0xa3b   :  { %v551_v53 = vmul.f32 %v1603_v51, %v549_v52 }
 0xa3d   :  { %553 = vrot.lane.b32.xlu1 %v551_v53, %s1753_s5 }
 0xaaf   :  { %v554_v56 = vpop.permute.xlu1 %553 }
 0xab0   :  { %v556_v57 = vadd.f32 %v554_v56, %v546_v55 }
 0xab2   :  { %1604 = vtanh.f32 %v556_v57  ;;  %v620_v12 = vrot.slane %v556_v57, 6 }
 0xabc   :  { %v1605_v32 = vpop.eup %1604 }
 0xabd   :  { %559 = vrot.lane.b32.xlu0 %v1605_v32, %s1747_s23 }
 0xb2f   :  { %v560_v58 = vpop.permute.xlu0 %559 }
 0xb30   :  { %v562_v59 = vmul.f32 %v1603_v51, %v560_v58 }
 0xb32   :  { %v563_v60 = vpack.c.bf16 %v562_v59, %v562_v59 }
 0xb34   :  { %v565_v61 = vrot.slane %v563_v60, 3 }
 0xb36   :  { %566 = vrot.lane.b32.xlu1 %v565_v61, %s1753_s5 }
 0xba8   :  { %v567_v62 = vpop.permute.xlu1 %566 }
 0xba9   :  { %1482 = vmatmul.mubr.msk.bf16.vlgmr.msra.gmra.mrb[16].mxu1 %vm258_vm6, %v567_v62 }
 0xbaa   :  { %1494 = vmatpush3.bf16.msra.mxu1 %v1853_v13  ;;  %1497 = vmatprep.mubr.msk.bf16.mxu1 %vm1751_vm0, %v1750_v1 }
 0xbab   :  { %1495 = vmatprep.subr.bf16.mxu1 %v1750_v1 }
 0xbae   :  { %1496 = vmatpush3.bf16.msra.mxu1 %v1861_v15 }
 0xbaf   :  { %1509 = vmatprep.subr.bf16.mxu1 %v1750_v1 }
 0xc7c   :  { %v605_v63 = vpop.f32.mrb[16].mxu1 }
 0xc7d   :  { %v611_v0 = vadd.f32 %v605_v63, %v1894_v35  ;;  %v1483_v2 = vpop.f32.mrb[17].mxu1 }
 0xc7e   :  { %v608_v3 = vpop.f32.mrb[18].mxu1 }
 0xc7f   :  { %1606 = vtanh.f32 %v611_v0  ;;  %v1484_v4 = vpop.f32.mrb[19].mxu1  ;;  %v1347_v6 = vmul.f32 -1.442695, %v611_v0 }
 0xc81   :  { %1608 = vpow2.f32 %v1347_v6 }
 0xc89   :  { %v1607_v5 = vpop.eup %1606 }
 0xc8a   :  { %624 = vrot.lane.b32.xlu0 %v1607_v5, %s1747_s23 }
 0xc8b   :  { %v1609_v7 = vpop.eup %1608 }
 0xc8c   :  { %v615_v8 = vadd.f32 1.0, %v1609_v7 }
 0xc8e   :  { %1610 = vrcp.f32 %v615_v8 }
 0xc98   :  { %v1611_v9 = vpop.eup %1610 }
 0xc99   :  { %v622_v14 = vmul.f32 %v1611_v9, %v620_v12 }
 0xcfc   :  { %v625_v10 = vpop.permute.xlu0 %624 }
 0xcfd   :  { %v627_v11 = vmul.f32 %v1611_v9, %v625_v10 }
 0xcff   :  { %629 = vrot.lane.b32.xlu1 %v627_v11, %s1753_s5 }
 0xd71   :  { %v630_v16 = vpop.permute.xlu1 %629 }
 0xd72   :  { %v632_v17 = vadd.f32 %v630_v16, %v622_v14 }
 0xd74   :  { %1612 = vtanh.f32 %v632_v17  ;;  %v698_v40 = vrot.slane %v632_v17, 6 }
 0xd7e   :  { %v1613_v18 = vpop.eup %1612 }
 0xd7f   :  { %635 = vrot.lane.b32.xlu0 %v1613_v18, %s1747_s23 }
 0xdf1   :  { %v636_v19 = vpop.permute.xlu0 %635 }
 0xdf2   :  { %v638_v20 = vmul.f32 %v1611_v9, %v636_v19 }
 0xdf4   :  { %v639_v22 = vpack.c.bf16 %v638_v20, %v638_v20 }
 0xdf6   :  { %641 = vrot.lane.b32.xlu1 %v639_v22, %s1753_s5 }
 0xe68   :  { %v642_v23 = vpop.permute.xlu1 %641 }
 0xe69   :  { %1490 = vmatmul.mubr.msk.bf16.vlgmr.msra.gmra.mrb[8].mxu0 %vm258_vm6, %v642_v23 }
 0xe6a   :  { %1502 = vmatpush3.bf16.msra.mxu0 %v1853_v13  ;;  %1505 = vmatprep.mubr.msk.bf16.mxu0 %vm1751_vm0, %v1750_v1 }
 0xe6b   :  { %1503 = vmatprep.subr.bf16.mxu0 %v1750_v1 }
 0xe6e   :  { %1504 = vmatpush3.bf16.msra.mxu0 %v1861_v15 }
 0xe6f   :  { %1517 = vmatprep.subr.bf16.mxu0 %v1750_v1 }
 0xf3c   :  { %v680_v25 = vpop.f32.mrb[8].mxu0 }
 0xf3d   :  { %v687_v26 = vrot.slane %v680_v25, 6  ;;  %v1491_v27 = vpop.f32.mrb[9].mxu0 }
 0xf3e   :  { %v683_v28 = vpop.f32.mrb[10].mxu0 }
 0xf3f   :  { %v689_v29 = vadd.f32 %v687_v26, %v1894_v35  ;;  %v1492_v30 = vpop.f32.mrb[11].mxu0 }
 0xf41   :  { %1614 = vtanh.f32 %v689_v29  ;;  %v1349_v33 = vmul.f32 -1.442695, %v689_v29 }
 0xf43   :  { %1616 = vpow2.f32 %v1349_v33 }
 0xf4b   :  { %v1615_v31 = vpop.eup %1614 }
 0xf4c   :  { %702 = vrot.lane.b32.xlu0 %v1615_v31, %s1747_s23 }
 0xf4d   :  { %v1617_v34 = vpop.eup %1616 }
 0xf4e   :  { %v693_v36 = vadd.f32 1.0, %v1617_v34 }
 0xf50   :  { %1618 = vrcp.f32 %v693_v36 }
 0xf5a   :  { %v1619_v37 = vpop.eup %1618 }
 0xf5b   :  { %v700_v41 = vmul.f32 %v1619_v37, %v698_v40 }
 0xfbe   :  { %v703_v38 = vpop.permute.xlu0 %702 }
 0xfbf   :  { %v705_v39 = vmul.f32 %v1619_v37, %v703_v38 }
 0xfc1   :  { %707 = vrot.lane.b32.xlu1 %v705_v39, %s1753_s5 }
0x1033   :  { %v708_v42 = vpop.permute.xlu1 %707 }
0x1034   :  { %v710_v43 = vadd.f32 %v708_v42, %v700_v41 }
0x1036   :  { %1620 = vtanh.f32 %v710_v43  ;;  %v777_v62 = vrot.slane %v710_v43, 6 }
0x1040   :  { %v1621_v44 = vpop.eup %1620 }
0x1041   :  { %713 = vrot.lane.b32.xlu0 %v1621_v44, %s1747_s23 }
0x10b3   :  { %v714_v45 = vpop.permute.xlu0 %713 }
0x10b4   :  { %v716_v46 = vmul.f32 %v1619_v37, %v714_v45  ;;  %v1333_v37 = vld [vmem:[%s2075_s4] ss:$0 sm:$0xff] }
0x10b5   :  { %v1995_v38 = vadd.f32 %v1333_v37, %v1889_v24 }
0x10b6   :  { %v717_v47 = vpack.c.bf16 %v716_v46, %v716_v46 }
0x10b8   :  { %v719_v48 = vrot.slane %v717_v47, 1 }
0x10ba   :  { %720 = vrot.lane.b32.xlu1 %v719_v48, %s1753_s5 }
0x112c   :  { %v721_v49 = vpop.permute.xlu1 %720 }
0x112d   :  { %1498 = vmatmul.mubr.msk.bf16.vlgmr.msra.gmra.mrb[20].mxu1 %vm258_vm6, %v721_v49 }
0x112e   :  { %1510 = vmatpush3.bf16.msra.mxu1 %v1853_v13  ;;  %1513 = vmatprep.mubr.msk.bf16.mxu1 %vm1751_vm0, %v1750_v1 }
0x112f   :  { %1511 = vmatprep.subr.bf16.mxu1 %v1750_v1 }
0x1132   :  { %1512 = vmatpush3.bf16.msra.mxu1 %v1861_v15 }
0x1133   :  { %1525 = vmatprep.subr.bf16.mxu1 %v1750_v1 }
0x1200   :  { %v759_v50 = vpop.f32.mrb[20].mxu1 }
0x1201   :  { %v766_v51 = vrot.slane %v759_v50, 4  ;;  %v1499_v52 = vpop.f32.mrb[21].mxu1 }
0x1202   :  { %v762_v53 = vpop.f32.mrb[22].mxu1 }
0x1203   :  { %v768_v54 = vadd.f32 %v766_v51, %v1894_v35  ;;  %v1500_v55 = vpop.f32.mrb[23].mxu1 }
0x1205   :  { %1622 = vtanh.f32 %v768_v54  ;;  %v1351_v57 = vmul.f32 -1.442695, %v768_v54 }
0x1207   :  { %1624 = vpow2.f32 %v1351_v57 }
0x120f   :  { %v1623_v56 = vpop.eup %1622 }
0x1210   :  { %781 = vrot.lane.b32.xlu0 %v1623_v56, %s1747_s23 }
0x1211   :  { %v1625_v32 = vpop.eup %1624 }
0x1212   :  { %v772_v58 = vadd.f32 1.0, %v1625_v32 }
0x1214   :  { %1626 = vrcp.f32 %v772_v58 }
0x121e   :  { %v1627_v59 = vpop.eup %1626 }
0x121f   :  { %v779_v63 = vmul.f32 %v1627_v59, %v777_v62 }
0x1282   :  { %v782_v60 = vpop.permute.xlu0 %781 }
0x1283   :  { %v784_v61 = vmul.f32 %v1627_v59, %v782_v60 }
0x1285   :  { %786 = vrot.lane.b32.xlu1 %v784_v61, %s1753_s5 }
0x12f7   :  { %v787_v0 = vpop.permute.xlu1 %786 }
0x12f8   :  { %v789_v2 = vadd.f32 %v787_v0, %v779_v63 }
0x12fa   :  { %1628 = vtanh.f32 %v789_v2  ;;  %v856_v26 = vrot.slane %v789_v2, 6 }
0x1304   :  { %v1629_v3 = vpop.eup %1628 }
0x1305   :  { %792 = vrot.lane.b32.xlu0 %v1629_v3, %s1747_s23 }
0x1377   :  { %v793_v4 = vpop.permute.xlu0 %792 }
0x1378   :  { %v795_v5 = vmul.f32 %v1627_v59, %v793_v4 }
0x137a   :  { %v796_v6 = vpack.c.bf16 %v795_v5, %v795_v5 }
0x137c   :  { %v798_v7 = vrot.slane %v796_v6, 2 }
0x137e   :  { %799 = vrot.lane.b32.xlu1 %v798_v7, %s1753_s5 }
0x13f0   :  { %v800_v8 = vpop.permute.xlu1 %799 }
0x13f1   :  { %1506 = vmatmul.mubr.msk.bf16.vlgmr.msra.gmra.mrb[12].mxu0 %vm258_vm6, %v800_v8 }
0x13f2   :  { %1518 = vmatpush3.bf16.msra.mxu0 %v1853_v13  ;;  %1521 = vmatprep.mubr.msk.bf16.mxu0 %vm1751_vm0, %v1750_v1 }
0x13f3   :  { %1519 = vmatprep.subr.bf16.mxu0 %v1750_v1 }
0x13f6   :  { %1520 = vmatpush3.bf16.msra.mxu0 %v1861_v15 }
0x13f7   :  { %1533 = vmatprep.subr.bf16.mxu0 %v1750_v1 }
0x14c4   :  { %v838_v9 = vpop.f32.mrb[12].mxu0 }
0x14c5   :  { %v845_v10 = vrot.slane %v838_v9, 2  ;;  %v1507_v11 = vpop.f32.mrb[13].mxu0 }
0x14c6   :  { %v841_v12 = vpop.f32.mrb[14].mxu0 }
0x14c7   :  { %v847_v14 = vadd.f32 %v845_v10, %v1894_v35  ;;  %v1508_v16 = vpop.f32.mrb[15].mxu0 }
0x14c9   :  { %1630 = vtanh.f32 %v847_v14  ;;  %v1353_v18 = vmul.f32 -1.442695, %v847_v14 }
0x14cb   :  { %1632 = vpow2.f32 %v1353_v18 }
0x14d3   :  { %v1631_v17 = vpop.eup %1630 }
0x14d4   :  { %860 = vrot.lane.b32.xlu0 %v1631_v17, %s1747_s23 }
0x14d5   :  { %v1633_v19 = vpop.eup %1632 }
0x14d6   :  { %v851_v20 = vadd.f32 1.0, %v1633_v19 }
0x14d8   :  { %1634 = vrcp.f32 %v851_v20 }
0x14e2   :  { %v1635_v22 = vpop.eup %1634 }
0x14e3   :  { %v858_v27 = vmul.f32 %v1635_v22, %v856_v26 }
0x1546   :  { %v861_v23 = vpop.permute.xlu0 %860 }
0x1547   :  { %v863_v25 = vmul.f32 %v1635_v22, %v861_v23 }
0x1549   :  { %865 = vrot.lane.b32.xlu1 %v863_v25, %s1753_s5 }
0x15bb   :  { %v866_v28 = vpop.permute.xlu1 %865 }
0x15bc   :  { %v868_v29 = vadd.f32 %v866_v28, %v858_v27 }
0x15be   :  { %1636 = vtanh.f32 %v868_v29  ;;  %v932_v24 = vrot.slane %v868_v29, 6 }
0x15c8   :  { %v1637_v35 = vpop.eup %1636 }
0x15c9   :  { %871 = vrot.lane.b32.xlu0 %v1637_v35, %s1747_s23 }
0x163b   :  { %v872_v30 = vpop.permute.xlu0 %871 }
0x163c   :  { %v874_v31 = vmul.f32 %v1635_v22, %v872_v30 }
0x163e   :  { %v875_v33 = vpack.c.bf16 %v874_v31, %v874_v31 }
0x1640   :  { %v877_v34 = vrot.slane %v875_v33, 3 }
0x1642   :  { %878 = vrot.lane.b32.xlu1 %v877_v34, %s1753_s5 }
0x16b4   :  { %v879_v36 = vpop.permute.xlu1 %878 }
0x16b5   :  { %1514 = vmatmul.mubr.msk.bf16.vlgmr.msra.gmra.mrb[24].mxu1 %vm258_vm6, %v879_v36 }
0x16b6   :  { %1526 = vmatpush3.bf16.msra.mxu1 %v1853_v13  ;;  %1529 = vmatprep.mubr.msk.bf16.mxu1 %vm1751_vm0, %v1750_v1 }
0x16b7   :  { %1527 = vmatprep.subr.bf16.mxu1 %v1750_v1 }
0x16ba   :  { %1528 = vmatpush3.bf16.msra.mxu1 %v1861_v15 }
0x16bb   :  { %1541 = vmatprep.subr.bf16.mxu1 %v1750_v1 }
0x1788   :  { %v917_v39 = vpop.f32.mrb[24].mxu1 }
0x1789   :  { %v923_v40 = vadd.f32 %v917_v39, %v1995_v38  ;;  %v1515_v41 = vpop.f32.mrb[25].mxu1 }
0x178a   :  { %v920_v42 = vpop.f32.mrb[26].mxu1 }
0x178b   :  { %1638 = vtanh.f32 %v923_v40  ;;  %v1516_v43 = vpop.f32.mrb[27].mxu1  ;;  %v1355_v45 = vmul.f32 -1.442695, %v923_v40 }
0x178d   :  { %1640 = vpow2.f32 %v1355_v45 }
0x1795   :  { %v1639_v44 = vpop.eup %1638 }
0x1796   :  { %936 = vrot.lane.b32.xlu0 %v1639_v44, %s1747_s23 }
0x1797   :  { %v1641_v46 = vpop.eup %1640 }
0x1798   :  { %v927_v47 = vadd.f32 1.0, %v1641_v46 }
0x179a   :  { %1642 = vrcp.f32 %v927_v47 }
0x17a4   :  { %v1643_v48 = vpop.eup %1642 }
0x17a5   :  { %v934_v51 = vmul.f32 %v1643_v48, %v932_v24 }
0x1808   :  { %v937_v49 = vpop.permute.xlu0 %936 }
0x1809   :  { %v939_v50 = vmul.f32 %v1643_v48, %v937_v49 }
0x180b   :  { %941 = vrot.lane.b32.xlu1 %v939_v50, %s1753_s5 }
0x187d   :  { %v942_v52 = vpop.permute.xlu1 %941 }
0x187e   :  { %v944_v53 = vadd.f32 %v942_v52, %v934_v51 }
0x1880   :  { %1644 = vtanh.f32 %v944_v53 }
0x188a   :  { %v1645_v54 = vpop.eup %1644 }
0x188b   :  { %947 = vrot.lane.b32.xlu0 %v1645_v54, %s1747_s23 }
0x18fd   :  { %v948_v55 = vpop.permute.xlu0 %947 }
0x18fe   :  { %v950_v56 = vmul.f32 %v1643_v48, %v948_v55 }
0x1900   :  { %v951_v57 = vpack.c.bf16 %v950_v56, %v950_v56 }
0x1902   :  { %953 = vrot.lane.b32.xlu1 %v951_v57, %s1753_s5 }
0x1974   :  { %v954_v32 = vpop.permute.xlu1 %953 }
0x1975   :  { %1522 = vmatmul.mubr.msk.bf16.vlgmr.msra.gmra.mrb[16].mxu0 %vm258_vm6, %v954_v32 }
0x1976   :  { %1534 = vmatpush3.bf16.msra.mxu0 %v1853_v13  ;;  %1537 = vmatprep.mubr.msk.bf16.mxu0 %vm1751_vm0, %v1750_v1 }
0x1977   :  { %1535 = vmatprep.subr.bf16.mxu0 %v1750_v1 }
0x197a   :  { %1536 = vmatpush3.bf16.msra.mxu0 %v1861_v15  ;;  %v1010_v15 = vrot.slane %v944_v53, 6 }
0x1a48   :  { %v992_v58 = vpop.f32.mrb[16].mxu0 }
0x1a49   :  { %v999_v59 = vrot.slane %v992_v58, 6  ;;  %v1523_v60 = vpop.f32.mrb[17].mxu0 }
0x1a4a   :  { %v995_v61 = vpop.f32.mrb[18].mxu0  ;;  %v1573_v60 = vld [vmem:[%s2077_s6 + $0x8] sm:$0xff]  }
0x1a4b   :  { %v1001_v62 = vadd.f32 %v999_v59, %v1995_v38  ;;  %v1524_v63 = vpop.f32.mrb[19].mxu0 }
0x1a4d   :  { %1646 = vtanh.f32 %v1001_v62  ;;  %v1357_v2 = vmul.f32 -1.442695, %v1001_v62 }
0x1a4f   :  { %1648 = vpow2.f32 %v1357_v2 }
0x1a57   :  { %v1647_v0 = vpop.eup %1646 }
0x1a58   :  { %1014 = vrot.lane.b32.xlu0 %v1647_v0, %s1747_s23 }
0x1a59   :  { %v1649_v13 = vpop.eup %1648 }
0x1a5a   :  { %v1005_v3 = vadd.f32 1.0, %v1649_v13 }
0x1a5c   :  { %1650 = vrcp.f32 %v1005_v3  ;;  %v1362_v3 = vld [vmem:[%s2078_s7] ss:$0 sm:$0xff]  ;;  %s1754_s7 = smov [#allocation5]  }
0x1a66   :  { %v1651_v4 = vpop.eup %1650 }
0x1a67   :  { %v1012_v7 = vmul.f32 %v1651_v4, %v1010_v15 }
0x1aca   :  { %v1015_v5 = vpop.permute.xlu0 %1014 }
0x1acb   :  { %v1017_v6 = vmul.f32 %v1651_v4, %v1015_v5 }
0x1acd   :  { %1019 = vrot.lane.b32.xlu1 %v1017_v6, %s1753_s5 }
0x1b3f   :  { %v1020_v8 = vpop.permute.xlu1 %1019 }
0x1b40   :  { %v1022_v9 = vadd.f32 %v1020_v8, %v1012_v7  ;;  %v1272_v8 = vld [vmem:[%s2079_s8] sm:$0x3]  ;;  %s1298_s8 = sshll.u32 %s1754_s7, 4  ;;  %s1299_s8 = int_to_ptr.vmem [resolvable:$true] %s1298_s8 }
0x1b41   :  { %s1696_s25 = scalar_lea.vmem %s1299_s8, 32  ;;  %p1701_p9 = scmp.lt.s32.totalorder %s1299_s8, %s1299_s8 }
0x1b42   :  { %1652 = vtanh.f32 %v1022_v9  ;;  %v1089_v33 = vrot.slane %v1022_v9, 6  ;;  %p1697_p8 = scmp.ne.s32.totalorder %s1299_s8, %s1696_s25  ;;  %p1702_p10 = scmp.lt.s32.totalorder %s1696_s25, %s1696_s25 }
0x1b44   :  { %p1703_p11 = por %p1702_p10, %p1701_p9 }
0x1b46   :  { %p1704_p12 = pnand %p1703_p11, %p1697_p8 }
0x1b4c   :  { %v1653_v10 = vpop.eup %1652 }
0x1b4d   :  { %1025 = vrot.lane.b32.xlu0 %v1653_v10, %s1747_s23 }
0x1bbf   :  { %v1026_v11 = vpop.permute.xlu0 %1025 }
0x1bc0   :  { %v1028_v12 = vmul.f32 %v1651_v4, %v1026_v11 }
0x1bc2   :  { %v1029_v14 = vpack.c.bf16 %v1028_v12, %v1028_v12 }
0x1bc4   :  { %v1031_v16 = vrot.slane %v1029_v14, 1 }
0x1bc6   :  { %1032 = vrot.lane.b32.xlu1 %v1031_v16, %s1753_s5 }
0x1c38   :  { %v1033_v17 = vpop.permute.xlu1 %1032 }
0x1c39   :  { %1530 = vmatmul.mubr.msk.bf16.vlgmr.msra.gmra.mrb[28].mxu1 %vm258_vm6, %v1033_v17 }
0x1c3a   :  { %1545 = vmatprep.mubr.msk.bf16.mxu1 %vm1751_vm0, %v1750_v1 }
0x1d0c   :  { %v1071_v18 = vpop.f32.mrb[28].mxu1 }
0x1d0d   :  { %v1078_v19 = vrot.slane %v1071_v18, 4  ;;  %v1531_v20 = vpop.f32.mrb[29].mxu1 }
0x1d0e   :  { %v1074_v22 = vpop.f32.mrb[30].mxu1 }
0x1d0f   :  { %v1080_v23 = vadd.f32 %v1078_v19, %v1995_v38  ;;  %v1532_v25 = vpop.f32.mrb[31].mxu1 }
0x1d11   :  { %1654 = vtanh.f32 %v1080_v23  ;;  %v1359_v27 = vmul.f32 -1.442695, %v1080_v23 }
0x1d13   :  { %1656 = vpow2.f32 %v1359_v27 }
0x1d1b   :  { %v1655_v26 = vpop.eup %1654 }
0x1d1c   :  { %1093 = vrot.lane.b32.xlu0 %v1655_v26, %s1747_s23 }
0x1d1d   :  { %v1657_v28 = vpop.eup %1656 }
0x1d1e   :  { %v1084_v29 = vadd.f32 1.0, %v1657_v28 }
0x1d20   :  { %1658 = vrcp.f32 %v1084_v29 }
0x1d2a   :  { %v1659_v35 = vpop.eup %1658 }
0x1d2b   :  { %v1091_v34 = vmul.f32 %v1659_v35, %v1089_v33 }
0x1d8e   :  { %v1094_v30 = vpop.permute.xlu0 %1093 }
0x1d8f   :  { %v1096_v31 = vmul.f32 %v1659_v35, %v1094_v30 }
0x1d91   :  { %1098 = vrot.lane.b32.xlu1 %v1096_v31, %s1753_s5 }
0x1e03   :  { %v1099_v36 = vpop.permute.xlu1 %1098 }
0x1e04   :  { %v1101_v37 = vadd.f32 %v1099_v36, %v1091_v34 }
0x1e06   :  { %1660 = vtanh.f32 %v1101_v37  ;;  %v1168_v57 = vrot.slane %v1101_v37, 6 }
0x1e10   :  { %v1661_v39 = vpop.eup %1660 }
0x1e11   :  { %1104 = vrot.lane.b32.xlu0 %v1661_v39, %s1747_s23 }
0x1e83   :  { %v1105_v40 = vpop.permute.xlu0 %1104 }
0x1e84   :  { %v1107_v41 = vmul.f32 %v1659_v35, %v1105_v40 }
0x1e86   :  { %v1108_v42 = vpack.c.bf16 %v1107_v41, %v1107_v41 }
0x1e88   :  { %v1110_v43 = vrot.slane %v1108_v42, 2 }
0x1e8a   :  { %1111 = vrot.lane.b32.xlu1 %v1110_v43, %s1753_s5 }
0x1efc   :  { %v1112_v44 = vpop.permute.xlu1 %1111 }
0x1efd   :  { %1538 = vmatmul.mubr.msk.bf16.vlgmr.msra.gmra.mrb[20].mxu0 %vm258_vm6, %v1112_v44 }
0x1fd0   :  { %v1150_v45 = vpop.f32.mrb[20].mxu0 }
0x1fd1   :  { %v1157_v46 = vrot.slane %v1150_v45, 2  ;;  %v1539_v47 = vpop.f32.mrb[21].mxu0 }
0x1fd2   :  { %v1153_v48 = vpop.f32.mrb[22].mxu0 }
0x1fd3   :  { %v1159_v49 = vadd.f32 %v1157_v46, %v1995_v38  ;;  %v1540_v50 = vpop.f32.mrb[23].mxu0  ;;  %v1572_v38 = vld [vmem:[%s2077_s6] sm:$0xff]  }
0x1fd4   :  { %1542 = vmatpush3.bf16.msra.mxu1 %v1572_v38 }
0x1fd5   :  { %1662 = vtanh.f32 %v1159_v49  ;;  %v1361_v51 = vmul.f32 -1.442695, %v1159_v49  ;;  %1543 = vmatprep.subr.bf16.mxu1 %v1750_v1 }
0x1fd7   :  { %1664 = vpow2.f32 %v1361_v51 }
0x1fd8   :  { %1544 = vmatpush3.bf16.msra.mxu1 %v1573_v60 }
0x1fdf   :  { %v1663_v24 = vpop.eup %1662 }
0x1fe0   :  { %1172 = vrot.lane.b32.xlu0 %v1663_v24, %s1747_s23 }
0x1fe1   :  { %v1665_v52 = vpop.eup %1664 }
0x1fe2   :  { %v1163_v53 = vadd.f32 1.0, %v1665_v52 }
0x1fe4   :  { %1666 = vrcp.f32 %v1163_v53 }
0x1fee   :  { %v1667_v54 = vpop.eup %1666 }
0x1fef   :  { %v1170_v32 = vmul.f32 %v1667_v54, %v1168_v57 }
0x2052   :  { %v1173_v55 = vpop.permute.xlu0 %1172 }
0x2053   :  { %v1175_v56 = vmul.f32 %v1667_v54, %v1173_v55 }
0x2055   :  { %1177 = vrot.lane.b32.xlu1 %v1175_v56, %s1753_s5 }
0x20c7   :  { %v1178_v58 = vpop.permute.xlu1 %1177 }
0x20c8   :  { %v1180_v59 = vadd.f32 %v1178_v58, %v1170_v32 }
0x20ca   :  { %1668 = vtanh.f32 %v1180_v59 }
0x20d4   :  { %v1669_v61 = vpop.eup %1668 }
0x20d5   :  { %1183 = vrot.lane.b32.xlu0 %v1669_v61, %s1747_s23 }
0x2147   :  { %v1184_v62 = vpop.permute.xlu0 %1183 }
0x2148   :  { %v1186_v63 = vmul.f32 %v1667_v54, %v1184_v62 }
0x214a   :  { %v1187_v0 = vpack.c.bf16 %v1186_v63, %v1186_v63 }
0x214c   :  { %v1200_v2 = vrot.slane %v1187_v0, 3 }
0x214e   :  { %1201 = vrot.lane.b32.xlu1 %v1200_v2, %s1753_s5 }
0x21c0   :  { %v1202_v13 = vpop.permute.xlu1 %1201 }
0x21c1   :  { %1546 = vmatmul.mubr.msk.bf16.vlgmr.msra.gmra.mrb[32].mxu1 %vm258_vm6, %v1202_v13 }
0x2294   :  { %v1252_v4 = vpop.f32.mrb[32].mxu1 }
0x2295   :  { %v1253_v1 = vadd.f32 %v1362_v3, %v1252_v4  ;;  %v1547_v5 = vpop.f32.mrb[33].mxu1 }
0x2296   :  { %v1255_v6 = vpop.f32.mrb[34].mxu1 }
0x2297   :  { %v1548_v15 = vpop.f32.mrb[35].mxu1  ;;  %v1260_v7 = vsel %vm1258_vm7, %v1253_v1, -inf  ;;  %1259 = vst.msk [vmem:[#allocation5] sm:$0x3] %vm1258_vm7, %v1253_v1 }
0x2298   :  { %1261 = vmax.xlane.f32.xlu0 %v1260_v7 }
0x22ae   :  { %1274 = vperm.xlu0 %1559, %v1272_v8  }
0x2325   :  { %v1262_v9 = vpop.xlane.xlu0 %1261 }
0x2326   :  { %v1263_v10 = vsub.f32 %v1253_v1, %v1262_v9 }
0x2328   :  { %v1264_v11 = vmul.f32 1.442695, %v1263_v10 }
0x232a   :  { %1670 = vpow2.f32 %v1264_v11 }
0x232d   :  { %v1275_v18 = vpop.permute.xlu0 %1274 }
0x232e   :  { %vm1276_vm8 = vcmp.eq.s32.totalorder %v1879_v21, %v1275_v18 }
0x2334   :  { %v1671_v12 = vpop.eup %1670 }
0x2335   :  { %v1266_v14 = vsel %vm1258_vm7, %v1671_v12, 0.0 }
0x2336   :  { %1267 = vadd.xlane.f32.xlu1 %v1266_v14 }
0x23c3   :  { %v1268_v16 = vpop.xlane.xlu1 %1267 }
0x23c4   :  { %1672 = vlog2.f32 %v1268_v16 }
0x23ce   :  { %v1673_v17 = vpop.eup %1672 }
0x23cf   :  { %v1270_v19 = vmul.f32 0.6931472, %v1673_v17 }
0x23d1   :  { %v1271_v20 = vsub.f32 %v1263_v10, %v1270_v19 }
0x23d3   :  { %v1277_v22 = vsel %vm1276_vm8, %v1271_v20, 0.0 }
0x23d4   :  { %v1278_v23 = vsel %vm1258_vm7, %v1277_v22, 0.0 }
0x23d5   :  { %1279 = vadd.xlane.f32.xlu1 %v1278_v23 }
0x23d6   :  { %1707 = shalt.err (!%p1704_p12)
}
0x23d7   :  { %s1708_s28 = scalar_lea.hbm %s2080_s9, 32 }
0x23d8   :  { %p1709_p13 = scmp.ne.s32.totalorder %s2080_s9, %s1708_s28  ;;  %p1712_p0 = scmp.lt.u32.totalorder %s1708_s28, %s2080_s9 }
0x23da   :  { %p1714_p1 = pnand %p1712_p0, %p1709_p13 }
0x23dc   :  { %1717 = shalt.err (!%p1714_p1)
}
0x23dd   :  { %1301 = dma.vmem_to_hbm [thread:$0]  %s1299_s8, 32, %s2080_s9, [#allocation4]   ;;  %vm1290_vm9 = vcmask 0  }
0x23de   :  { %s1755_s0 = smov [#allocation6]  }
0x23df   :  { %s1308_s14 = sshll.u32 %s1755_s0, 4  ;;  %s1309_s14 = int_to_ptr.vmem [resolvable:$true] %s1308_s14 }
0x23e0   :  { %s1718_s15 = scalar_lea.vmem %s1309_s14, 16  ;;  %s1722_s16 = scalar_lea.vmem %s1309_s14, 32 }
0x23e1   :  { %p1719_p2 = scmp.ne.s32.totalorder %s1309_s14, %s1718_s15  ;;  %p1723_p3 = scmp.lt.s32.totalorder %s1309_s14, %s1309_s14 }
0x23e2   :  { %p1724_p4 = scmp.lt.s32.totalorder %s1722_s16, %s1718_s15 }
0x23e4   :  { %p1725_p5 = por %p1724_p4, %p1723_p3 }
0x23e6   :  { %p1726_p6 = pnand %p1725_p5, %p1719_p2 }
0x2462   :  { %v1280_v21 = vpop.xlane.xlu1 %1279 }
0x2463   :  { %v1281_v25 = vsel %vm198_vm1, %v1280_v21, 0.0 }
0x2464   :  { %v1282_v26 = vrot.slane %v1281_v25, 4 }
0x2466   :  { %v1283_v27 = vadd.f32 %v1282_v26, %v1281_v25 }
0x2468   :  { %v1284_v28 = vrot.slane %v1283_v27, 2 }
0x246a   :  { %v1285_v29 = vadd.f32 %v1284_v28, %v1283_v27 }
0x246c   :  { %v1286_v35 = vrot.slane %v1285_v29, 1 }
0x246e   :  { %v1287_v30 = vadd.f32 %v1286_v35, %v1285_v29 }
0x2470   :  { %v1288_v31 = vsub.f32 0.0, %v1287_v30 }
0x2472   :  { %v1289_v33 = vmul.f32 0.5, %v1288_v31 }
0x2474   :  { %1291 = vst.msk [vmem:[#allocation6] sm:$0x1] %vm1290_vm9, %v1289_v33 }
0x2475   :  { %1729 = shalt.err (!%p1726_p6)
}
0x2476   :  { %s1730_s3 = scalar_lea.hbm %s2081_s10, 16 }
0x2477   :  { %p1731_p7 = scmp.ne.s32.totalorder %s2081_s10, %s1730_s3  ;;  %p1734_p8 = scmp.lt.u32.totalorder %s1730_s3, %s2081_s10 }
0x2479   :  { %p1736_p9 = pnand %p1734_p8, %p1731_p7 }
0x247b   :  { %1739 = shalt.err (!%p1736_p9)
}
0x247c   :  { %1311 = dma.vmem_to_hbm [thread:$0]  %s1309_s14, 16, %s2081_s10, [#allocation7]  }
0x247d   :  { %1742 = dma.done.wait [#allocation4], 32  }
0x247e   :  { %1743 = vsyncadd [#allocation4], 4294967264 }
0x247f   :  { %1744 = dma.done.wait [#allocation7], 16  }
0x2480   :  { %1745 = vsyncadd [#allocation7], 4294967280 }
0x2481   :  { %1318 = vsyncpa [#allocation3], 1 }
0x2482   :  { %1319 = vsyncpa [#allocation4], 1 }
0x2483   :  { %1320 = vsyncpa [#allocation7], 1 }

</bundles_post_ra>
